<compile_context>
chip_gen: v6e
topology: v6e:2x2x1
jax: 0.10.0
libtpu: 0.0.40
codegen_flags: <defaults>
</compile_context>

<pallas_src>
import functools
import math

import numpy as np
import jax
import jax.numpy as jnp
from jax import lax
from jax.experimental import pallas as pl
from jax.experimental.pallas import tpu as pltpu


def _round_up(x, m):
    return ((x + m - 1) // m) * m


# ----------------------------------------------------------------------------
# Parameter packing (PyTorch layout -> kernel layout)
# ----------------------------------------------------------------------------
def _reorder_ifgo_to_ifog(a):
    """Reorder the packed-gate (last) axis from (i,f,g,o) to (i,f,o,g)."""
    H = a.shape[-1] // 4
    return jnp.concatenate(
        [a[..., : 2 * H], a[..., 3 * H :], a[..., 2 * H : 3 * H]], axis=-1
    )


def pack_lstm_layer(weight_ih, weight_hh, bias_ih, bias_hh):
    """PyTorch nn.LSTM layer params -> kernel layout.

    weight_ih: (4H, D_in), weight_hh: (4H, H), biases: (4H,) in gate order (i,f,g,o).
    Returns w_ih: (D_in, 4H), w_hh: (H, 4H), b: (1, 4H) in gate order (i,f,o,g).
    """
    w_ih = _reorder_ifgo_to_ifog(weight_ih.T)
    w_hh = _reorder_ifgo_to_ifog(weight_hh.T)
    b = _reorder_ifgo_to_ifog((bias_ih + bias_hh)[None, :])
    return w_ih, w_hh, b


def init_params(key, input_dim, hidden_dim, layer_dim, output_dim):
    """Deterministic init mirroring PyTorch's U(-1/sqrt(H), 1/sqrt(H)), then packed."""
    k = 1.0 / (float(hidden_dim) ** 0.5)
    params = {"lstm": []}
    for layer in range(layer_dim):
        d_in = input_dim if layer == 0 else hidden_dim
        key, k1, k2, k3, k4 = jax.random.split(key, 5)
        weight_ih = jax.random.uniform(k1, (4 * hidden_dim, d_in), jnp.float32, -k, k)
        weight_hh = jax.random.uniform(k2, (4 * hidden_dim, hidden_dim), jnp.float32, -k, k)
        bias_ih = jax.random.uniform(k3, (4 * hidden_dim,), jnp.float32, -k, k)
        bias_hh = jax.random.uniform(k4, (4 * hidden_dim,), jnp.float32, -k, k)
        params["lstm"].append(pack_lstm_layer(weight_ih, weight_hh, bias_ih, bias_hh))
    key, k5, k6 = jax.random.split(key, 3)
    w_fc_pt = jax.random.uniform(k5, (output_dim, hidden_dim), jnp.float32, -k, k)
    b_fc_pt = jax.random.uniform(k6, (output_dim,), jnp.float32, -k, k)
    params["w_fc"] = w_fc_pt.T          # (H, O)
    params["b_fc"] = b_fc_pt[None, :]   # (1, O)
    return params


# ----------------------------------------------------------------------------
# Fused Pallas kernel (one batch tile per grid step)
# ----------------------------------------------------------------------------
def _make_fused_lstm_kernel(num_layers, seq_len, time_chunk, tile_b, hidden_dim,
                            compute_dtype, rec_unroll):
    L, T, Tc, Bt, H = num_layers, seq_len, time_chunk, tile_b, hidden_dim

    def kernel(*args):
        # inputs: x, (w_ih, w_hh, b) * L, w_fc, b_fc ; output: out ; scratch: gx, seq
        x_ref = args[0]                               # (T, Bt, D)       batch tile
        layer_refs = args[1 : 1 + 3 * L]
        w_fc_ref = args[1 + 3 * L]                    # (H, O_pad)
        b_fc_ref = args[2 + 3 * L]                    # (1, O_pad)
        out_ref = args[3 + 3 * L]                     # (Bt, O_pad)
        gx_sc = args[4 + 3 * L]                       # (Tc*Bt, 4H)  chunked x @ W_ih + b
        seq_sc = args[5 + 3 * L]                      # (T*Bt, H)    inter-layer activations

        h_top = None
        for layer in range(L):
            w_ih_ref = layer_refs[3 * layer]
            w_hh_ref = layer_refs[3 * layer + 1]
            b_ref = layer_refs[3 * layer + 2]
            is_last = layer == (L - 1)

            carry = (jnp.zeros((Bt, H), jnp.float32),   # h
                     jnp.zeros((Bt, H), jnp.float32))   # c

            for t0 in range(0, T, Tc):                  # static time-chunk loop
                tc = min(Tc, T - t0)

                # ---- hoisted input projection for this chunk (off the serial chain) ----
                if layer == 0:
                    # Per-timestep projection from the 3-D x block (no in-kernel reshape).
                    def proj0(j, acc, t0=t0, w_ih_ref=w_ih_ref, b_ref=b_ref):
                        g = jnp.dot(x_ref[t0 + j], w_ih_ref[...],
                                    preferred_element_type=jnp.float32) + b_ref[...]
                        row = pl.multiple_of(j * Bt, Bt)
                        gx_sc[pl.ds(row, Bt), :] = g.astype(gx_sc.dtype)
                        return acc
                    lax.fori_loop(0, tc, proj0, 0, unroll=True if tc <= 16 else 4)
                else:
                    # One MXU matmul over the whole chunk (tc*Bt rows), bias folded.
                    src = seq_sc[t0 * Bt : (t0 + tc) * Bt, :]
                    g = jnp.dot(src, w_ih_ref[...],
                                preferred_element_type=jnp.float32) + b_ref[...]
                    gx_sc[0 : tc * Bt, :] = g.astype(gx_sc.dtype)

                # ---- serial recurrence over the chunk ----
                def step(t, carry, w_hh_ref=w_hh_ref, t0=t0, write_seq=not is_last):
                    h_prev, c_prev = carry
                    row = pl.multiple_of(t * Bt, Bt)
                    # TODO(synk): pin w_hh in MXU weight registers across the loop
                    # (pltpu.matmul_push_rhs / matmul_acc_lhs) to shorten the h->h chain.
                    gates = gx_sc[pl.ds(row, Bt), :].astype(jnp.float32) + jnp.dot(
                        h_prev.astype(compute_dtype), w_hh_ref[...],
                        preferred_element_type=jnp.float32)
                    # gates packed as (i | f | o | g): one sigmoid slab + one tanh slab
                    sig = jax.nn.sigmoid(gates[:, : 3 * H])
                    g_g = jnp.tanh(gates[:, 3 * H :])
                    i_g = sig[:, :H]
                    f_g = sig[:, H : 2 * H]
                    o_g = sig[:, 2 * H : 3 * H]
                    c_new = f_g * c_prev + i_g * g_g
                    h_new = o_g * jnp.tanh(c_new)
                    if write_seq:  # last layer: only final h is needed (FC below)
                        orow = pl.multiple_of((t0 + t) * Bt, Bt)
                        seq_sc[pl.ds(orow, Bt), :] = h_new.astype(seq_sc.dtype)
                    return (h_new, c_new)

                carry = lax.fori_loop(0, tc, step, carry, unroll=rec_unroll)

            h_top = carry[0]

        # FC + sigmoid on the top layer's final-timestep hidden state (lane-dense O_pad).
        # TODO(synk): nn.Dropout(0.2) is identity in eval mode; training-mode masking
        # is not reproduced here.
        y = jnp.dot(h_top.astype(compute_dtype), w_fc_ref[...],
                    preferred_element_type=jnp.float32) + b_fc_ref[...]
        out_ref[...] = jax.nn.sigmoid(y)

    return kernel


def _resident_spec(shape):
    rank = len(shape)
    return pl.BlockSpec(tuple(shape), lambda i, _r=rank: (0,) * _r)


def lstm_model_forward(x, params, *, compute_dtype=jnp.float32, time_chunk=64):
    """x: (B, T, input_dim) -> (B, output_dim). h0 = c0 = 0, as in init_hidden()."""
    B, T, D = x.shape
    L = len(params["lstm"])
    H = params["lstm"][0][1].shape[0]
    O = params["w_fc"].shape[1]
    cdt = np.dtype(compute_dtype)

    sublane = 8 if cdt.itemsize == 4 else 16
    TILE_B = min(_round_up(B, sublane), 256)   # feed the MXU a real M when B permits
    Bp = _round_up(B, TILE_B)
    O_pad = _round_up(O, 128)                  # lane-dense output slab
    Tc = max(1, min(T, time_chunk))            # bound gx scratch to O(Tc) timesteps
    rec_unroll = True if (Tc <= 16 and TILE_B <= 64) else 2

    # Time-major, batch-padded, compute-dtype input: (T, Bp, D). Padded rows are zeros.
    x_tbd = jnp.transpose(x, (1, 0, 2)).astype(cdt)
    x_pad = jnp.pad(x_tbd, ((0, 0), (0, Bp - B), (0, 0)))

    flat_w = []
    in_specs = [pl.BlockSpec((T, TILE_B, D), lambda i: (0, i, 0))]
    for (w_ih, w_hh, b) in params["lstm"]:
        flat_w += [w_ih.astype(cdt), w_hh.astype(cdt), b.astype(jnp.float32)]
        in_specs += [_resident_spec(w_ih.shape), _resident_spec(w_hh.shape),
                     _resident_spec(b.shape)]
    w_fc = jnp.pad(params["w_fc"], ((0, 0), (0, O_pad - O))).astype(cdt)
    b_fc = jnp.pad(params["b_fc"], ((0, 0), (0, O_pad - O))).astype(jnp.float32)
    flat_w += [w_fc, b_fc]
    in_specs += [_resident_spec(w_fc.shape), _resident_spec(b_fc.shape)]

    scratch_shapes = [
        pltpu.VMEM((Tc * TILE_B, 4 * H), cdt),   # chunked hoisted x @ W_ih + b
        pltpu.VMEM((T * TILE_B, H), cdt),        # inter-layer activations
    ]

    # Explicit VMEM budget: double-buffered tiles + resident weights + scratch + headroom.
    def nbytes(shape, dt):
        return math.prod(shape) * np.dtype(dt).itemsize
    weight_bytes = sum(nbytes(w.shape, w.dtype) for w in flat_w)
    tile_bytes = nbytes((T, TILE_B, D), cdt) + nbytes((TILE_B, O_pad), jnp.float32)
    scratch_bytes = (nbytes((Tc * TILE_B, 4 * H), cdt)
                     + nbytes((T * TILE_B, H), cdt))
    need = 2 * (weight_bytes + 2 * tile_bytes) + scratch_bytes + (4 << 20)
    vmem_limit = int(min(max(need, 32 << 20), 96 << 20))

    kernel = _make_fused_lstm_kernel(L, T, Tc, TILE_B, H, cdt, rec_unroll)

    out = pl.pallas_call(
        kernel,
        out_shape=jax.ShapeDtypeStruct((Bp, O_pad), jnp.float32),
        grid=(Bp // TILE_B,),
        in_specs=in_specs,
        out_specs=pl.BlockSpec((TILE_B, O_pad), lambda i: (i, 0)),
        scratch_shapes=scratch_shapes,
        compiler_params=pltpu.CompilerParams(
            dimension_semantics=("parallel",),   # batch tiles -> v7x megacore
            vmem_limit_bytes=vmem_limit),
    )(x_pad, *flat_w)
    return out[:B, :O]


# ----------------------------------------------------------------------------
# Pure-JAX reference (same packed params) for correctness check
# ----------------------------------------------------------------------------
def lstm_model_reference(x, params):
    hp = jax.lax.Precision.HIGHEST
    B = x.shape[0]
    seq = jnp.transpose(x, (1, 0, 2))  # (T, B, D)
    h_last = None
    for (w_ih, w_hh, b) in params["lstm"]:
        H = w_hh.shape[0]

        def step(carry, x_t, w_ih=w_ih, w_hh=w_hh, b=b, H=H):
            h, c = carry
            gates = jnp.dot(x_t, w_ih, precision=hp) + jnp.dot(h, w_hh, precision=hp) + b
            i_g = jax.nn.sigmoid(gates[:, :H])
            f_g = jax.nn.sigmoid(gates[:, H : 2 * H])
            o_g = jax.nn.sigmoid(gates[:, 2 * H : 3 * H])
            g_g = jnp.tanh(gates[:, 3 * H :])
            c_new = f_g * c + i_g * g_g
            h_new = o_g * jnp.tanh(c_new)
            return (h_new, c_new), h_new

        init = (jnp.zeros((B, H), jnp.float32), jnp.zeros((B, H), jnp.float32))
        (h_fin, _), seq = lax.scan(step, init, seq)
        h_last = h_fin
    y = jnp.dot(h_last, params["w_fc"], precision=hp) + params["b_fc"]
    return jax.nn.sigmoid(y)


if __name__ == "__main__":
    B, T = 2, 8
    INPUT_DIM, HIDDEN_DIM, LAYER_DIM, OUTPUT_DIM = 16, 32, 2, 4

    key = jax.random.PRNGKey(0)
    key, xk = jax.random.split(key)
    x = jax.random.normal(xk, (B, T, INPUT_DIM), jnp.float32)

    params = init_params(key, INPUT_DIM, HIDDEN_DIM, LAYER_DIM, OUTPUT_DIM)

    ref = jax.block_until_ready(lstm_model_reference(x, params))

    # f32 path: tight check against the HIGHEST-precision reference.
    fwd_f32 = jax.jit(functools.partial(lstm_model_forward, compute_dtype=jnp.float32))
    out_f32 = jax.block_until_ready(fwd_f32(x, params))
    assert out_f32.shape == (B, OUTPUT_DIM)
    assert bool(jnp.all(jnp.isfinite(out_f32)))
    assert bool(jnp.all((out_f32 >= 0.0) & (out_f32 <= 1.0)))          # sigmoid range
    assert bool(jnp.allclose(out_f32, ref, atol=2e-4, rtol=2e-4))

    # bf16 weights/activations (f32 accumulation & carries): looser tolerance.
    fwd_bf16 = jax.jit(functools.partial(lstm_model_forward, compute_dtype=jnp.bfloat16))
    out_bf16 = jax.block_until_ready(fwd_bf16(x, params))
    assert out_bf16.shape == (B, OUTPUT_DIM)
    assert bool(jnp.all(jnp.isfinite(out_bf16)))
    assert bool(jnp.all((out_bf16 >= 0.0) & (out_bf16 <= 1.0)))
    assert bool(jnp.allclose(out_bf16, ref, atol=6e-2, rtol=6e-2))

    print("KERNEL_OK")
</pallas_src>

<mosaic_0001>
module attributes {stable_mosaic.version = 11 : i64} {
  func.func @kernel(%arg0: i32, %arg1: memref<8x8x16xf32, #tpu.memory_space<vmem>>, %arg2: memref<16x128xf32, #tpu.memory_space<vmem>>, %arg3: memref<32x128xf32, #tpu.memory_space<vmem>>, %arg4: memref<1x128xf32, #tpu.memory_space<vmem>>, %arg5: memref<32x128xf32, #tpu.memory_space<vmem>>, %arg6: memref<32x128xf32, #tpu.memory_space<vmem>>, %arg7: memref<1x128xf32, #tpu.memory_space<vmem>>, %arg8: memref<32x128xf32, #tpu.memory_space<vmem>>, %arg9: memref<1x128xf32, #tpu.memory_space<vmem>>, %arg10: memref<8x128xf32, #tpu.memory_space<vmem>>, %arg11: memref<64x128xf32, #tpu.memory_space<vmem>>, %arg12: memref<64x32xf32, #tpu.memory_space<vmem>>) attributes {dimension_semantics = [#tpu.dimension_semantics<parallel>], iteration_bounds = array<i64: 1>, scalar_prefetch = 0 : i64, scratch_operands = 2 : i64, tpu.core_type = #tpu.core_type<tc>, window_params = [{transform_indices = @transform_0, window_bounds = array<i64: 8, 8, 16>}, {pipeline_mode = #tpu.pipeline_mode<synchronous>, transform_indices = @transform_1, window_bounds = array<i64: 16, 128>}, {pipeline_mode = #tpu.pipeline_mode<synchronous>, transform_indices = @transform_2, window_bounds = array<i64: 32, 128>}, {pipeline_mode = #tpu.pipeline_mode<synchronous>, transform_indices = @transform_3, window_bounds = array<i64: 1, 128>}, {pipeline_mode = #tpu.pipeline_mode<synchronous>, transform_indices = @transform_4, window_bounds = array<i64: 32, 128>}, {pipeline_mode = #tpu.pipeline_mode<synchronous>, transform_indices = @transform_5, window_bounds = array<i64: 32, 128>}, {pipeline_mode = #tpu.pipeline_mode<synchronous>, transform_indices = @transform_6, window_bounds = array<i64: 1, 128>}, {pipeline_mode = #tpu.pipeline_mode<synchronous>, transform_indices = @transform_7, window_bounds = array<i64: 32, 128>}, {pipeline_mode = #tpu.pipeline_mode<synchronous>, transform_indices = @transform_8, window_bounds = array<i64: 1, 128>}, {transform_indices = @transform_9, window_bounds = array<i64: 8, 128>}]} {
    %cst = arith.constant 0.000000e+00 : f32
    %0 = vector.broadcast %cst : f32 to vector<8x32xf32>
    %cst_0 = arith.constant 0.000000e+00 : f32
    %1 = vector.broadcast %cst_0 : f32 to vector<8x32xf32>
    %c0_i32 = arith.constant 0 : i32
    %c0_i32_1 = arith.constant 0 : i32
    %2 = arith.addi %c0_i32_1, %c0_i32 : i32
    %3 = arith.index_cast %2 : i32 to index
    %c0 = arith.constant 0 : index
    %c0_2 = arith.constant 0 : index
    %4 = vector.load %arg1[%3, %c0, %c0_2] : memref<8x8x16xf32, #tpu.memory_space<vmem>>, vector<1x8x16xf32>
    %5 = vector.shape_cast %4 : vector<1x8x16xf32> to vector<8x16xf32>
    %c0_3 = arith.constant 0 : index
    %c0_4 = arith.constant 0 : index
    %6 = vector.load %arg2[%c0_3, %c0_4] : memref<16x128xf32, #tpu.memory_space<vmem>>, vector<16x128xf32>
    %cst_5 = arith.constant dense<0.000000e+00> : vector<8x128xf32>
    %7 = tpu.matmul %5, %6, %cst_5 {dimension_numbers = #tpu.dot_dimension_numbers<[1], [0], [0], [1], [0, 0, 1, 1], [], []>} : vector<8x16xf32>, vector<16x128xf32>, vector<8x128xf32> -> vector<8x128xf32>
    %c0_6 = arith.constant 0 : index
    %c0_7 = arith.constant 0 : index
    %8 = vector.load %arg4[%c0_6, %c0_7] : memref<1x128xf32, #tpu.memory_space<vmem>>, vector<1x128xf32>
    %9 = vector.broadcast %8 : vector<1x128xf32> to vector<8x128xf32>
    %10 = arith.addf %7, %9 : vector<8x128xf32>
    %c8_i32 = arith.constant 8 : i32
    %11 = arith.muli %c0_i32, %c8_i32 : i32
    %12 = tpu.assume_multiple %11, 8 : i32
    %13 = arith.index_cast %12 : i32 to index
    %c0_8 = arith.constant 0 : index
    %14 = vector.load %arg11[%13, %c0_8] : memref<64x128xf32, #tpu.memory_space<vmem>>, vector<8x128xf32>
    tpu.vector_store %arg11[%13, %c0_8], %10 {strides = array<i32>} : memref<64x128xf32, #tpu.memory_space<vmem>>, vector<8x128xf32>,
    %c1_i32 = arith.constant 1 : i32
    %c0_i32_9 = arith.constant 0 : i32
    %15 = arith.addi %c0_i32_9, %c1_i32 : i32
    %16 = arith.index_cast %15 : i32 to index
    %c0_10 = arith.constant 0 : index
    %c0_11 = arith.constant 0 : index
    %17 = vector.load %arg1[%16, %c0_10, %c0_11] : memref<8x8x16xf32, #tpu.memory_space<vmem>>, vector<1x8x16xf32>
    %18 = vector.shape_cast %17 : vector<1x8x16xf32> to vector<8x16xf32>
    %c0_12 = arith.constant 0 : index
    %c0_13 = arith.constant 0 : index
    %19 = vector.load %arg2[%c0_12, %c0_13] : memref<16x128xf32, #tpu.memory_space<vmem>>, vector<16x128xf32>
    %cst_14 = arith.constant dense<0.000000e+00> : vector<8x128xf32>
    %20 = tpu.matmul %18, %19, %cst_14 {dimension_numbers = #tpu.dot_dimension_numbers<[1], [0], [0], [1], [0, 0, 1, 1], [], []>} : vector<8x16xf32>, vector<16x128xf32>, vector<8x128xf32> -> vector<8x128xf32>
    %c0_15 = arith.constant 0 : index
    %c0_16 = arith.constant 0 : index
    %21 = vector.load %arg4[%c0_15, %c0_16] : memref<1x128xf32, #tpu.memory_space<vmem>>, vector<1x128xf32>
    %22 = vector.broadcast %21 : vector<1x128xf32> to vector<8x128xf32>
    %23 = arith.addf %20, %22 : vector<8x128xf32>
    %c8_i32_17 = arith.constant 8 : i32
    %24 = arith.muli %c1_i32, %c8_i32_17 : i32
    %25 = tpu.assume_multiple %24, 8 : i32
    %26 = arith.index_cast %25 : i32 to index
    %c0_18 = arith.constant 0 : index
    %27 = vector.load %arg11[%26, %c0_18] : memref<64x128xf32, #tpu.memory_space<vmem>>, vector<8x128xf32>
    tpu.vector_store %arg11[%26, %c0_18], %23 {strides = array<i32>} : memref<64x128xf32, #tpu.memory_space<vmem>>, vector<8x128xf32>,
    %c2_i32 = arith.constant 2 : i32
    %c0_i32_19 = arith.constant 0 : i32
    %28 = arith.addi %c0_i32_19, %c2_i32 : i32
    %29 = arith.index_cast %28 : i32 to index
    %c0_20 = arith.constant 0 : index
    %c0_21 = arith.constant 0 : index
    %30 = vector.load %arg1[%29, %c0_20, %c0_21] : memref<8x8x16xf32, #tpu.memory_space<vmem>>, vector<1x8x16xf32>
    %31 = vector.shape_cast %30 : vector<1x8x16xf32> to vector<8x16xf32>
    %c0_22 = arith.constant 0 : index
    %c0_23 = arith.constant 0 : index
    %32 = vector.load %arg2[%c0_22, %c0_23] : memref<16x128xf32, #tpu.memory_space<vmem>>, vector<16x128xf32>
    %cst_24 = arith.constant dense<0.000000e+00> : vector<8x128xf32>
    %33 = tpu.matmul %31, %32, %cst_24 {dimension_numbers = #tpu.dot_dimension_numbers<[1], [0], [0], [1], [0, 0, 1, 1], [], []>} : vector<8x16xf32>, vector<16x128xf32>, vector<8x128xf32> -> vector<8x128xf32>
    %c0_25 = arith.constant 0 : index
    %c0_26 = arith.constant 0 : index
    %34 = vector.load %arg4[%c0_25, %c0_26] : memref<1x128xf32, #tpu.memory_space<vmem>>, vector<1x128xf32>
    %35 = vector.broadcast %34 : vector<1x128xf32> to vector<8x128xf32>
    %36 = arith.addf %33, %35 : vector<8x128xf32>
    %c8_i32_27 = arith.constant 8 : i32
    %37 = arith.muli %c2_i32, %c8_i32_27 : i32
    %38 = tpu.assume_multiple %37, 8 : i32
    %39 = arith.index_cast %38 : i32 to index
    %c0_28 = arith.constant 0 : index
    %40 = vector.load %arg11[%39, %c0_28] : memref<64x128xf32, #tpu.memory_space<vmem>>, vector<8x128xf32>
    tpu.vector_store %arg11[%39, %c0_28], %36 {strides = array<i32>} : memref<64x128xf32, #tpu.memory_space<vmem>>, vector<8x128xf32>,
    %c3_i32 = arith.constant 3 : i32
    %c0_i32_29 = arith.constant 0 : i32
    %41 = arith.addi %c0_i32_29, %c3_i32 : i32
    %42 = arith.index_cast %41 : i32 to index
    %c0_30 = arith.constant 0 : index
    %c0_31 = arith.constant 0 : index
    %43 = vector.load %arg1[%42, %c0_30, %c0_31] : memref<8x8x16xf32, #tpu.memory_space<vmem>>, vector<1x8x16xf32>
    %44 = vector.shape_cast %43 : vector<1x8x16xf32> to vector<8x16xf32>
    %c0_32 = arith.constant 0 : index
    %c0_33 = arith.constant 0 : index
    %45 = vector.load %arg2[%c0_32, %c0_33] : memref<16x128xf32, #tpu.memory_space<vmem>>, vector<16x128xf32>
    %cst_34 = arith.constant dense<0.000000e+00> : vector<8x128xf32>
    %46 = tpu.matmul %44, %45, %cst_34 {dimension_numbers = #tpu.dot_dimension_numbers<[1], [0], [0], [1], [0, 0, 1, 1], [], []>} : vector<8x16xf32>, vector<16x128xf32>, vector<8x128xf32> -> vector<8x128xf32>
    %c0_35 = arith.constant 0 : index
    %c0_36 = arith.constant 0 : index
    %47 = vector.load %arg4[%c0_35, %c0_36] : memref<1x128xf32, #tpu.memory_space<vmem>>, vector<1x128xf32>
    %48 = vector.broadcast %47 : vector<1x128xf32> to vector<8x128xf32>
    %49 = arith.addf %46, %48 : vector<8x128xf32>
    %c8_i32_37 = arith.constant 8 : i32
    %50 = arith.muli %c3_i32, %c8_i32_37 : i32
    %51 = tpu.assume_multiple %50, 8 : i32
    %52 = arith.index_cast %51 : i32 to index
    %c0_38 = arith.constant 0 : index
    %53 = vector.load %arg11[%52, %c0_38] : memref<64x128xf32, #tpu.memory_space<vmem>>, vector<8x128xf32>
    tpu.vector_store %arg11[%52, %c0_38], %49 {strides = array<i32>} : memref<64x128xf32, #tpu.memory_space<vmem>>, vector<8x128xf32>,
    %c4_i32 = arith.constant 4 : i32
    %c0_i32_39 = arith.constant 0 : i32
    %54 = arith.addi %c0_i32_39, %c4_i32 : i32
    %55 = arith.index_cast %54 : i32 to index
    %c0_40 = arith.constant 0 : index
    %c0_41 = arith.constant 0 : index
    %56 = vector.load %arg1[%55, %c0_40, %c0_41] : memref<8x8x16xf32, #tpu.memory_space<vmem>>, vector<1x8x16xf32>
    %57 = vector.shape_cast %56 : vector<1x8x16xf32> to vector<8x16xf32>
    %c0_42 = arith.constant 0 : index
    %c0_43 = arith.constant 0 : index
    %58 = vector.load %arg2[%c0_42, %c0_43] : memref<16x128xf32, #tpu.memory_space<vmem>>, vector<16x128xf32>
    %cst_44 = arith.constant dense<0.000000e+00> : vector<8x128xf32>
    %59 = tpu.matmul %57, %58, %cst_44 {dimension_numbers = #tpu.dot_dimension_numbers<[1], [0], [0], [1], [0, 0, 1, 1], [], []>} : vector<8x16xf32>, vector<16x128xf32>, vector<8x128xf32> -> vector<8x128xf32>
    %c0_45 = arith.constant 0 : index
    %c0_46 = arith.constant 0 : index
    %60 = vector.load %arg4[%c0_45, %c0_46] : memref<1x128xf32, #tpu.memory_space<vmem>>, vector<1x128xf32>
    %61 = vector.broadcast %60 : vector<1x128xf32> to vector<8x128xf32>
    %62 = arith.addf %59, %61 : vector<8x128xf32>
    %c8_i32_47 = arith.constant 8 : i32
    %63 = arith.muli %c4_i32, %c8_i32_47 : i32
    %64 = tpu.assume_multiple %63, 8 : i32
    %65 = arith.index_cast %64 : i32 to index
    %c0_48 = arith.constant 0 : index
    %66 = vector.load %arg11[%65, %c0_48] : memref<64x128xf32, #tpu.memory_space<vmem>>, vector<8x128xf32>
    tpu.vector_store %arg11[%65, %c0_48], %62 {strides = array<i32>} : memref<64x128xf32, #tpu.memory_space<vmem>>, vector<8x128xf32>,
    %c5_i32 = arith.constant 5 : i32
    %c0_i32_49 = arith.constant 0 : i32
    %67 = arith.addi %c0_i32_49, %c5_i32 : i32
    %68 = arith.index_cast %67 : i32 to index
    %c0_50 = arith.constant 0 : index
    %c0_51 = arith.constant 0 : index
    %69 = vector.load %arg1[%68, %c0_50, %c0_51] : memref<8x8x16xf32, #tpu.memory_space<vmem>>, vector<1x8x16xf32>
    %70 = vector.shape_cast %69 : vector<1x8x16xf32> to vector<8x16xf32>
    %c0_52 = arith.constant 0 : index
    %c0_53 = arith.constant 0 : index
    %71 = vector.load %arg2[%c0_52, %c0_53] : memref<16x128xf32, #tpu.memory_space<vmem>>, vector<16x128xf32>
    %cst_54 = arith.constant dense<0.000000e+00> : vector<8x128xf32>
    %72 = tpu.matmul %70, %71, %cst_54 {dimension_numbers = #tpu.dot_dimension_numbers<[1], [0], [0], [1], [0, 0, 1, 1], [], []>} : vector<8x16xf32>, vector<16x128xf32>, vector<8x128xf32> -> vector<8x128xf32>
    %c0_55 = arith.constant 0 : index
    %c0_56 = arith.constant 0 : index
    %73 = vector.load %arg4[%c0_55, %c0_56] : memref<1x128xf32, #tpu.memory_space<vmem>>, vector<1x128xf32>
    %74 = vector.broadcast %73 : vector<1x128xf32> to vector<8x128xf32>
    %75 = arith.addf %72, %74 : vector<8x128xf32>
    %c8_i32_57 = arith.constant 8 : i32
    %76 = arith.muli %c5_i32, %c8_i32_57 : i32
    %77 = tpu.assume_multiple %76, 8 : i32
    %78 = arith.index_cast %77 : i32 to index
    %c0_58 = arith.constant 0 : index
    %79 = vector.load %arg11[%78, %c0_58] : memref<64x128xf32, #tpu.memory_space<vmem>>, vector<8x128xf32>
    tpu.vector_store %arg11[%78, %c0_58], %75 {strides = array<i32>} : memref<64x128xf32, #tpu.memory_space<vmem>>, vector<8x128xf32>,
    %c6_i32 = arith.constant 6 : i32
    %c0_i32_59 = arith.constant 0 : i32
    %80 = arith.addi %c0_i32_59, %c6_i32 : i32
    %81 = arith.index_cast %80 : i32 to index
    %c0_60 = arith.constant 0 : index
    %c0_61 = arith.constant 0 : index
    %82 = vector.load %arg1[%81, %c0_60, %c0_61] : memref<8x8x16xf32, #tpu.memory_space<vmem>>, vector<1x8x16xf32>
    %83 = vector.shape_cast %82 : vector<1x8x16xf32> to vector<8x16xf32>
    %c0_62 = arith.constant 0 : index
    %c0_63 = arith.constant 0 : index
    %84 = vector.load %arg2[%c0_62, %c0_63] : memref<16x128xf32, #tpu.memory_space<vmem>>, vector<16x128xf32>
    %cst_64 = arith.constant dense<0.000000e+00> : vector<8x128xf32>
    %85 = tpu.matmul %83, %84, %cst_64 {dimension_numbers = #tpu.dot_dimension_numbers<[1], [0], [0], [1], [0, 0, 1, 1], [], []>} : vector<8x16xf32>, vector<16x128xf32>, vector<8x128xf32> -> vector<8x128xf32>
    %c0_65 = arith.constant 0 : index
    %c0_66 = arith.constant 0 : index
    %86 = vector.load %arg4[%c0_65, %c0_66] : memref<1x128xf32, #tpu.memory_space<vmem>>, vector<1x128xf32>
    %87 = vector.broadcast %86 : vector<1x128xf32> to vector<8x128xf32>
    %88 = arith.addf %85, %87 : vector<8x128xf32>
    %c8_i32_67 = arith.constant 8 : i32
    %89 = arith.muli %c6_i32, %c8_i32_67 : i32
    %90 = tpu.assume_multiple %89, 8 : i32
    %91 = arith.index_cast %90 : i32 to index
    %c0_68 = arith.constant 0 : index
    %92 = vector.load %arg11[%91, %c0_68] : memref<64x128xf32, #tpu.memory_space<vmem>>, vector<8x128xf32>
    tpu.vector_store %arg11[%91, %c0_68], %88 {strides = array<i32>} : memref<64x128xf32, #tpu.memory_space<vmem>>, vector<8x128xf32>,
    %c7_i32 = arith.constant 7 : i32
    %c0_i32_69 = arith.constant 0 : i32
    %93 = arith.addi %c0_i32_69, %c7_i32 : i32
    %94 = arith.index_cast %93 : i32 to index
    %c0_70 = arith.constant 0 : index
    %c0_71 = arith.constant 0 : index
    %95 = vector.load %arg1[%94, %c0_70, %c0_71] : memref<8x8x16xf32, #tpu.memory_space<vmem>>, vector<1x8x16xf32>
    %96 = vector.shape_cast %95 : vector<1x8x16xf32> to vector<8x16xf32>
    %c0_72 = arith.constant 0 : index
    %c0_73 = arith.constant 0 : index
    %97 = vector.load %arg2[%c0_72, %c0_73] : memref<16x128xf32, #tpu.memory_space<vmem>>, vector<16x128xf32>
    %cst_74 = arith.constant dense<0.000000e+00> : vector<8x128xf32>
    %98 = tpu.matmul %96, %97, %cst_74 {dimension_numbers = #tpu.dot_dimension_numbers<[1], [0], [0], [1], [0, 0, 1, 1], [], []>} : vector<8x16xf32>, vector<16x128xf32>, vector<8x128xf32> -> vector<8x128xf32>
    %c0_75 = arith.constant 0 : index
    %c0_76 = arith.constant 0 : index
    %99 = vector.load %arg4[%c0_75, %c0_76] : memref<1x128xf32, #tpu.memory_space<vmem>>, vector<1x128xf32>
    %100 = vector.broadcast %99 : vector<1x128xf32> to vector<8x128xf32>
    %101 = arith.addf %98, %100 : vector<8x128xf32>
    %c8_i32_77 = arith.constant 8 : i32
    %102 = arith.muli %c7_i32, %c8_i32_77 : i32
    %103 = tpu.assume_multiple %102, 8 : i32
    %104 = arith.index_cast %103 : i32 to index
    %c0_78 = arith.constant 0 : index
    %105 = vector.load %arg11[%104, %c0_78] : memref<64x128xf32, #tpu.memory_space<vmem>>, vector<8x128xf32>
    tpu.vector_store %arg11[%104, %c0_78], %101 {strides = array<i32>} : memref<64x128xf32, #tpu.memory_space<vmem>>, vector<8x128xf32>,
    %c8_i32_79 = arith.constant 8 : i32
    %c0_i32_80 = arith.constant 0 : i32
    %c8_i32_81 = arith.constant 8 : i32
    %106 = arith.muli %c0_i32_80, %c8_i32_81 : i32
    %107 = tpu.assume_multiple %106, 8 : i32
    %108 = arith.index_cast %107 : i32 to index
    %c0_82 = arith.constant 0 : index
    %109 = vector.load %arg11[%108, %c0_82] : memref<64x128xf32, #tpu.memory_space<vmem>>, vector<8x128xf32>
    %c0_83 = arith.constant 0 : index
    %c0_84 = arith.constant 0 : index
    %110 = vector.load %arg3[%c0_83, %c0_84] : memref<32x128xf32, #tpu.memory_space<vmem>>, vector<32x128xf32>
    %cst_85 = arith.constant dense<0.000000e+00> : vector<8x128xf32>
    %111 = tpu.matmul %0, %110, %cst_85 {dimension_numbers = #tpu.dot_dimension_numbers<[1], [0], [0], [1], [0, 0, 1, 1], [], []>} : vector<8x32xf32>, vector<32x128xf32>, vector<8x128xf32> -> vector<8x128xf32>
    %112 = arith.addf %109, %111 : vector<8x128xf32>
    %113 = vector.extract_strided_slice %112 {offsets = [0, 0], sizes = [8, 96], strides = [1, 1]} : vector<8x128xf32> to vector<8x96xf32>
    %114 = arith.negf %113 : vector<8x96xf32>
    %115 = math.exp %114 : vector<8x96xf32>
    %cst_86 = arith.constant 1.000000e+00 : f32
    %116 = vector.broadcast %cst_86 : f32 to vector<8x96xf32>
    %117 = arith.addf %116, %115 : vector<8x96xf32>
    %118 = arith.divf %116, %117 : vector<8x96xf32>
    %119 = vector.extract_strided_slice %112 {offsets = [0, 96], sizes = [8, 32], strides = [1, 1]} : vector<8x128xf32> to vector<8x32xf32>
    %120 = math.tanh %119 : vector<8x32xf32>
    %121 = vector.extract_strided_slice %118 {offsets = [0, 0], sizes = [8, 32], strides = [1, 1]} : vector<8x96xf32> to vector<8x32xf32>
    %122 = vector.extract_strided_slice %118 {offsets = [0, 32], sizes = [8, 32], strides = [1, 1]} : vector<8x96xf32> to vector<8x32xf32>
    %123 = vector.extract_strided_slice %118 {offsets = [0, 64], sizes = [8, 32], strides = [1, 1]} : vector<8x96xf32> to vector<8x32xf32>
    %124 = arith.mulf %122, %1 : vector<8x32xf32>
    %125 = arith.mulf %121, %120 : vector<8x32xf32>
    %126 = arith.addf %124, %125 : vector<8x32xf32>
    %127 = math.tanh %126 : vector<8x32xf32>
    %128 = arith.mulf %123, %127 : vector<8x32xf32>
    %c0_i32_87 = arith.constant 0 : i32
    %129 = arith.addi %c0_i32_87, %c0_i32_80 : i32
    %c8_i32_88 = arith.constant 8 : i32
    %130 = arith.muli %129, %c8_i32_88 : i32
    %131 = tpu.assume_multiple %130, 8 : i32
    %132 = arith.index_cast %131 : i32 to index
    %c0_89 = arith.constant 0 : index
    %133 = vector.load %arg12[%132, %c0_89] : memref<64x32xf32, #tpu.memory_space<vmem>>, vector<8x32xf32>
    tpu.vector_store %arg12[%132, %c0_89], %128 {strides = array<i32>} : memref<64x32xf32, #tpu.memory_space<vmem>>, vector<8x32xf32>,
    %c1_i32_90 = arith.constant 1 : i32
    %c8_i32_91 = arith.constant 8 : i32
    %134 = arith.muli %c1_i32_90, %c8_i32_91 : i32
    %135 = tpu.assume_multiple %134, 8 : i32
    %136 = arith.index_cast %135 : i32 to index
    %c0_92 = arith.constant 0 : index
    %137 = vector.load %arg11[%136, %c0_92] : memref<64x128xf32, #tpu.memory_space<vmem>>, vector<8x128xf32>
    %c0_93 = arith.constant 0 : index
    %c0_94 = arith.constant 0 : index
    %138 = vector.load %arg3[%c0_93, %c0_94] : memref<32x128xf32, #tpu.memory_space<vmem>>, vector<32x128xf32>
    %cst_95 = arith.constant dense<0.000000e+00> : vector<8x128xf32>
    %139 = tpu.matmul %128, %138, %cst_95 {dimension_numbers = #tpu.dot_dimension_numbers<[1], [0], [0], [1], [0, 0, 1, 1], [], []>} : vector<8x32xf32>, vector<32x128xf32>, vector<8x128xf32> -> vector<8x128xf32>
    %140 = arith.addf %137, %139 : vector<8x128xf32>
    %141 = vector.extract_strided_slice %140 {offsets = [0, 0], sizes = [8, 96], strides = [1, 1]} : vector<8x128xf32> to vector<8x96xf32>
    %142 = arith.negf %141 : vector<8x96xf32>
    %143 = math.exp %142 : vector<8x96xf32>
    %cst_96 = arith.constant 1.000000e+00 : f32
    %144 = vector.broadcast %cst_96 : f32 to vector<8x96xf32>
    %145 = arith.addf %144, %143 : vector<8x96xf32>
    %146 = arith.divf %144, %145 : vector<8x96xf32>
    %147 = vector.extract_strided_slice %140 {offsets = [0, 96], sizes = [8, 32], strides = [1, 1]} : vector<8x128xf32> to vector<8x32xf32>
    %148 = math.tanh %147 : vector<8x32xf32>
    %149 = vector.extract_strided_slice %146 {offsets = [0, 0], sizes = [8, 32], strides = [1, 1]} : vector<8x96xf32> to vector<8x32xf32>
    %150 = vector.extract_strided_slice %146 {offsets = [0, 32], sizes = [8, 32], strides = [1, 1]} : vector<8x96xf32> to vector<8x32xf32>
    %151 = vector.extract_strided_slice %146 {offsets = [0, 64], sizes = [8, 32], strides = [1, 1]} : vector<8x96xf32> to vector<8x32xf32>
    %152 = arith.mulf %150, %126 : vector<8x32xf32>
    %153 = arith.mulf %149, %148 : vector<8x32xf32>
    %154 = arith.addf %152, %153 : vector<8x32xf32>
    %155 = math.tanh %154 : vector<8x32xf32>
    %156 = arith.mulf %151, %155 : vector<8x32xf32>
    %c0_i32_97 = arith.constant 0 : i32
    %157 = arith.addi %c0_i32_97, %c1_i32_90 : i32
    %c8_i32_98 = arith.constant 8 : i32
    %158 = arith.muli %157, %c8_i32_98 : i32
    %159 = tpu.assume_multiple %158, 8 : i32
    %160 = arith.index_cast %159 : i32 to index
    %c0_99 = arith.constant 0 : index
    %161 = vector.load %arg12[%160, %c0_99] : memref<64x32xf32, #tpu.memory_space<vmem>>, vector<8x32xf32>
    tpu.vector_store %arg12[%160, %c0_99], %156 {strides = array<i32>} : memref<64x32xf32, #tpu.memory_space<vmem>>, vector<8x32xf32>,
    %c2_i32_100 = arith.constant 2 : i32
    %c8_i32_101 = arith.constant 8 : i32
    %162 = arith.muli %c2_i32_100, %c8_i32_101 : i32
    %163 = tpu.assume_multiple %162, 8 : i32
    %164 = arith.index_cast %163 : i32 to index
    %c0_102 = arith.constant 0 : index
    %165 = vector.load %arg11[%164, %c0_102] : memref<64x128xf32, #tpu.memory_space<vmem>>, vector<8x128xf32>
    %c0_103 = arith.constant 0 : index
    %c0_104 = arith.constant 0 : index
    %166 = vector.load %arg3[%c0_103, %c0_104] : memref<32x128xf32, #tpu.memory_space<vmem>>, vector<32x128xf32>
    %cst_105 = arith.constant dense<0.000000e+00> : vector<8x128xf32>
    %167 = tpu.matmul %156, %166, %cst_105 {dimension_numbers = #tpu.dot_dimension_numbers<[1], [0], [0], [1], [0, 0, 1, 1], [], []>} : vector<8x32xf32>, vector<32x128xf32>, vector<8x128xf32> -> vector<8x128xf32>
    %168 = arith.addf %165, %167 : vector<8x128xf32>
    %169 = vector.extract_strided_slice %168 {offsets = [0, 0], sizes = [8, 96], strides = [1, 1]} : vector<8x128xf32> to vector<8x96xf32>
    %170 = arith.negf %169 : vector<8x96xf32>
    %171 = math.exp %170 : vector<8x96xf32>
    %cst_106 = arith.constant 1.000000e+00 : f32
    %172 = vector.broadcast %cst_106 : f32 to vector<8x96xf32>
    %173 = arith.addf %172, %171 : vector<8x96xf32>
    %174 = arith.divf %172, %173 : vector<8x96xf32>
    %175 = vector.extract_strided_slice %168 {offsets = [0, 96], sizes = [8, 32], strides = [1, 1]} : vector<8x128xf32> to vector<8x32xf32>
    %176 = math.tanh %175 : vector<8x32xf32>
    %177 = vector.extract_strided_slice %174 {offsets = [0, 0], sizes = [8, 32], strides = [1, 1]} : vector<8x96xf32> to vector<8x32xf32>
    %178 = vector.extract_strided_slice %174 {offsets = [0, 32], sizes = [8, 32], strides = [1, 1]} : vector<8x96xf32> to vector<8x32xf32>
    %179 = vector.extract_strided_slice %174 {offsets = [0, 64], sizes = [8, 32], strides = [1, 1]} : vector<8x96xf32> to vector<8x32xf32>
    %180 = arith.mulf %178, %154 : vector<8x32xf32>
    %181 = arith.mulf %177, %176 : vector<8x32xf32>
    %182 = arith.addf %180, %181 : vector<8x32xf32>
    %183 = math.tanh %182 : vector<8x32xf32>
    %184 = arith.mulf %179, %183 : vector<8x32xf32>
    %c0_i32_107 = arith.constant 0 : i32
    %185 = arith.addi %c0_i32_107, %c2_i32_100 : i32
    %c8_i32_108 = arith.constant 8 : i32
    %186 = arith.muli %185, %c8_i32_108 : i32
    %187 = tpu.assume_multiple %186, 8 : i32
    %188 = arith.index_cast %187 : i32 to index
    %c0_109 = arith.constant 0 : index
    %189 = vector.load %arg12[%188, %c0_109] : memref<64x32xf32, #tpu.memory_space<vmem>>, vector<8x32xf32>
    tpu.vector_store %arg12[%188, %c0_109], %184 {strides = array<i32>} : memref<64x32xf32, #tpu.memory_space<vmem>>, vector<8x32xf32>,
    %c3_i32_110 = arith.constant 3 : i32
    %c8_i32_111 = arith.constant 8 : i32
    %190 = arith.muli %c3_i32_110, %c8_i32_111 : i32
    %191 = tpu.assume_multiple %190, 8 : i32
    %192 = arith.index_cast %191 : i32 to index
    %c0_112 = arith.constant 0 : index
    %193 = vector.load %arg11[%192, %c0_112] : memref<64x128xf32, #tpu.memory_space<vmem>>, vector<8x128xf32>
    %c0_113 = arith.constant 0 : index
    %c0_114 = arith.constant 0 : index
    %194 = vector.load %arg3[%c0_113, %c0_114] : memref<32x128xf32, #tpu.memory_space<vmem>>, vector<32x128xf32>
    %cst_115 = arith.constant dense<0.000000e+00> : vector<8x128xf32>
    %195 = tpu.matmul %184, %194, %cst_115 {dimension_numbers = #tpu.dot_dimension_numbers<[1], [0], [0], [1], [0, 0, 1, 1], [], []>} : vector<8x32xf32>, vector<32x128xf32>, vector<8x128xf32> -> vector<8x128xf32>
    %196 = arith.addf %193, %195 : vector<8x128xf32>
    %197 = vector.extract_strided_slice %196 {offsets = [0, 0], sizes = [8, 96], strides = [1, 1]} : vector<8x128xf32> to vector<8x96xf32>
    %198 = arith.negf %197 : vector<8x96xf32>
    %199 = math.exp %198 : vector<8x96xf32>
    %cst_116 = arith.constant 1.000000e+00 : f32
    %200 = vector.broadcast %cst_116 : f32 to vector<8x96xf32>
    %201 = arith.addf %200, %199 : vector<8x96xf32>
    %202 = arith.divf %200, %201 : vector<8x96xf32>
    %203 = vector.extract_strided_slice %196 {offsets = [0, 96], sizes = [8, 32], strides = [1, 1]} : vector<8x128xf32> to vector<8x32xf32>
    %204 = math.tanh %203 : vector<8x32xf32>
    %205 = vector.extract_strided_slice %202 {offsets = [0, 0], sizes = [8, 32], strides = [1, 1]} : vector<8x96xf32> to vector<8x32xf32>
    %206 = vector.extract_strided_slice %202 {offsets = [0, 32], sizes = [8, 32], strides = [1, 1]} : vector<8x96xf32> to vector<8x32xf32>
    %207 = vector.extract_strided_slice %202 {offsets = [0, 64], sizes = [8, 32], strides = [1, 1]} : vector<8x96xf32> to vector<8x32xf32>
    %208 = arith.mulf %206, %182 : vector<8x32xf32>
    %209 = arith.mulf %205, %204 : vector<8x32xf32>
    %210 = arith.addf %208, %209 : vector<8x32xf32>
    %211 = math.tanh %210 : vector<8x32xf32>
    %212 = arith.mulf %207, %211 : vector<8x32xf32>
    %c0_i32_117 = arith.constant 0 : i32
    %213 = arith.addi %c0_i32_117, %c3_i32_110 : i32
    %c8_i32_118 = arith.constant 8 : i32
    %214 = arith.muli %213, %c8_i32_118 : i32
    %215 = tpu.assume_multiple %214, 8 : i32
    %216 = arith.index_cast %215 : i32 to index
    %c0_119 = arith.constant 0 : index
    %217 = vector.load %arg12[%216, %c0_119] : memref<64x32xf32, #tpu.memory_space<vmem>>, vector<8x32xf32>
    tpu.vector_store %arg12[%216, %c0_119], %212 {strides = array<i32>} : memref<64x32xf32, #tpu.memory_space<vmem>>, vector<8x32xf32>,
    %c4_i32_120 = arith.constant 4 : i32
    %c8_i32_121 = arith.constant 8 : i32
    %218 = arith.muli %c4_i32_120, %c8_i32_121 : i32
    %219 = tpu.assume_multiple %218, 8 : i32
    %220 = arith.index_cast %219 : i32 to index
    %c0_122 = arith.constant 0 : index
    %221 = vector.load %arg11[%220, %c0_122] : memref<64x128xf32, #tpu.memory_space<vmem>>, vector<8x128xf32>
    %c0_123 = arith.constant 0 : index
    %c0_124 = arith.constant 0 : index
    %222 = vector.load %arg3[%c0_123, %c0_124] : memref<32x128xf32, #tpu.memory_space<vmem>>, vector<32x128xf32>
    %cst_125 = arith.constant dense<0.000000e+00> : vector<8x128xf32>
    %223 = tpu.matmul %212, %222, %cst_125 {dimension_numbers = #tpu.dot_dimension_numbers<[1], [0], [0], [1], [0, 0, 1, 1], [], []>} : vector<8x32xf32>, vector<32x128xf32>, vector<8x128xf32> -> vector<8x128xf32>
    %224 = arith.addf %221, %223 : vector<8x128xf32>
    %225 = vector.extract_strided_slice %224 {offsets = [0, 0], sizes = [8, 96], strides = [1, 1]} : vector<8x128xf32> to vector<8x96xf32>
    %226 = arith.negf %225 : vector<8x96xf32>
    %227 = math.exp %226 : vector<8x96xf32>
    %cst_126 = arith.constant 1.000000e+00 : f32
    %228 = vector.broadcast %cst_126 : f32 to vector<8x96xf32>
    %229 = arith.addf %228, %227 : vector<8x96xf32>
    %230 = arith.divf %228, %229 : vector<8x96xf32>
    %231 = vector.extract_strided_slice %224 {offsets = [0, 96], sizes = [8, 32], strides = [1, 1]} : vector<8x128xf32> to vector<8x32xf32>
    %232 = math.tanh %231 : vector<8x32xf32>
    %233 = vector.extract_strided_slice %230 {offsets = [0, 0], sizes = [8, 32], strides = [1, 1]} : vector<8x96xf32> to vector<8x32xf32>
    %234 = vector.extract_strided_slice %230 {offsets = [0, 32], sizes = [8, 32], strides = [1, 1]} : vector<8x96xf32> to vector<8x32xf32>
    %235 = vector.extract_strided_slice %230 {offsets = [0, 64], sizes = [8, 32], strides = [1, 1]} : vector<8x96xf32> to vector<8x32xf32>
    %236 = arith.mulf %234, %210 : vector<8x32xf32>
    %237 = arith.mulf %233, %232 : vector<8x32xf32>
    %238 = arith.addf %236, %237 : vector<8x32xf32>
    %239 = math.tanh %238 : vector<8x32xf32>
    %240 = arith.mulf %235, %239 : vector<8x32xf32>
    %c0_i32_127 = arith.constant 0 : i32
    %241 = arith.addi %c0_i32_127, %c4_i32_120 : i32
    %c8_i32_128 = arith.constant 8 : i32
    %242 = arith.muli %241, %c8_i32_128 : i32
    %243 = tpu.assume_multiple %242, 8 : i32
    %244 = arith.index_cast %243 : i32 to index
    %c0_129 = arith.constant 0 : index
    %245 = vector.load %arg12[%244, %c0_129] : memref<64x32xf32, #tpu.memory_space<vmem>>, vector<8x32xf32>
    tpu.vector_store %arg12[%244, %c0_129], %240 {strides = array<i32>} : memref<64x32xf32, #tpu.memory_space<vmem>>, vector<8x32xf32>,
    %c5_i32_130 = arith.constant 5 : i32
    %c8_i32_131 = arith.constant 8 : i32
    %246 = arith.muli %c5_i32_130, %c8_i32_131 : i32
    %247 = tpu.assume_multiple %246, 8 : i32
    %248 = arith.index_cast %247 : i32 to index
    %c0_132 = arith.constant 0 : index
    %249 = vector.load %arg11[%248, %c0_132] : memref<64x128xf32, #tpu.memory_space<vmem>>, vector<8x128xf32>
    %c0_133 = arith.constant 0 : index
    %c0_134 = arith.constant 0 : index
    %250 = vector.load %arg3[%c0_133, %c0_134] : memref<32x128xf32, #tpu.memory_space<vmem>>, vector<32x128xf32>
    %cst_135 = arith.constant dense<0.000000e+00> : vector<8x128xf32>
    %251 = tpu.matmul %240, %250, %cst_135 {dimension_numbers = #tpu.dot_dimension_numbers<[1], [0], [0], [1], [0, 0, 1, 1], [], []>} : vector<8x32xf32>, vector<32x128xf32>, vector<8x128xf32> -> vector<8x128xf32>
    %252 = arith.addf %249, %251 : vector<8x128xf32>
    %253 = vector.extract_strided_slice %252 {offsets = [0, 0], sizes = [8, 96], strides = [1, 1]} : vector<8x128xf32> to vector<8x96xf32>
    %254 = arith.negf %253 : vector<8x96xf32>
    %255 = math.exp %254 : vector<8x96xf32>
    %cst_136 = arith.constant 1.000000e+00 : f32
    %256 = vector.broadcast %cst_136 : f32 to vector<8x96xf32>
    %257 = arith.addf %256, %255 : vector<8x96xf32>
    %258 = arith.divf %256, %257 : vector<8x96xf32>
    %259 = vector.extract_strided_slice %252 {offsets = [0, 96], sizes = [8, 32], strides = [1, 1]} : vector<8x128xf32> to vector<8x32xf32>
    %260 = math.tanh %259 : vector<8x32xf32>
    %261 = vector.extract_strided_slice %258 {offsets = [0, 0], sizes = [8, 32], strides = [1, 1]} : vector<8x96xf32> to vector<8x32xf32>
    %262 = vector.extract_strided_slice %258 {offsets = [0, 32], sizes = [8, 32], strides = [1, 1]} : vector<8x96xf32> to vector<8x32xf32>
    %263 = vector.extract_strided_slice %258 {offsets = [0, 64], sizes = [8, 32], strides = [1, 1]} : vector<8x96xf32> to vector<8x32xf32>
    %264 = arith.mulf %262, %238 : vector<8x32xf32>
    %265 = arith.mulf %261, %260 : vector<8x32xf32>
    %266 = arith.addf %264, %265 : vector<8x32xf32>
    %267 = math.tanh %266 : vector<8x32xf32>
    %268 = arith.mulf %263, %267 : vector<8x32xf32>
    %c0_i32_137 = arith.constant 0 : i32
    %269 = arith.addi %c0_i32_137, %c5_i32_130 : i32
    %c8_i32_138 = arith.constant 8 : i32
    %270 = arith.muli %269, %c8_i32_138 : i32
    %271 = tpu.assume_multiple %270, 8 : i32
    %272 = arith.index_cast %271 : i32 to index
    %c0_139 = arith.constant 0 : index
    %273 = vector.load %arg12[%272, %c0_139] : memref<64x32xf32, #tpu.memory_space<vmem>>, vector<8x32xf32>
    tpu.vector_store %arg12[%272, %c0_139], %268 {strides = array<i32>} : memref<64x32xf32, #tpu.memory_space<vmem>>, vector<8x32xf32>,
    %c6_i32_140 = arith.constant 6 : i32
    %c8_i32_141 = arith.constant 8 : i32
    %274 = arith.muli %c6_i32_140, %c8_i32_141 : i32
    %275 = tpu.assume_multiple %274, 8 : i32
    %276 = arith.index_cast %275 : i32 to index
    %c0_142 = arith.constant 0 : index
    %277 = vector.load %arg11[%276, %c0_142] : memref<64x128xf32, #tpu.memory_space<vmem>>, vector<8x128xf32>
    %c0_143 = arith.constant 0 : index
    %c0_144 = arith.constant 0 : index
    %278 = vector.load %arg3[%c0_143, %c0_144] : memref<32x128xf32, #tpu.memory_space<vmem>>, vector<32x128xf32>
    %cst_145 = arith.constant dense<0.000000e+00> : vector<8x128xf32>
    %279 = tpu.matmul %268, %278, %cst_145 {dimension_numbers = #tpu.dot_dimension_numbers<[1], [0], [0], [1], [0, 0, 1, 1], [], []>} : vector<8x32xf32>, vector<32x128xf32>, vector<8x128xf32> -> vector<8x128xf32>
    %280 = arith.addf %277, %279 : vector<8x128xf32>
    %281 = vector.extract_strided_slice %280 {offsets = [0, 0], sizes = [8, 96], strides = [1, 1]} : vector<8x128xf32> to vector<8x96xf32>
    %282 = arith.negf %281 : vector<8x96xf32>
    %283 = math.exp %282 : vector<8x96xf32>
    %cst_146 = arith.constant 1.000000e+00 : f32
    %284 = vector.broadcast %cst_146 : f32 to vector<8x96xf32>
    %285 = arith.addf %284, %283 : vector<8x96xf32>
    %286 = arith.divf %284, %285 : vector<8x96xf32>
    %287 = vector.extract_strided_slice %280 {offsets = [0, 96], sizes = [8, 32], strides = [1, 1]} : vector<8x128xf32> to vector<8x32xf32>
    %288 = math.tanh %287 : vector<8x32xf32>
    %289 = vector.extract_strided_slice %286 {offsets = [0, 0], sizes = [8, 32], strides = [1, 1]} : vector<8x96xf32> to vector<8x32xf32>
    %290 = vector.extract_strided_slice %286 {offsets = [0, 32], sizes = [8, 32], strides = [1, 1]} : vector<8x96xf32> to vector<8x32xf32>
    %291 = vector.extract_strided_slice %286 {offsets = [0, 64], sizes = [8, 32], strides = [1, 1]} : vector<8x96xf32> to vector<8x32xf32>
    %292 = arith.mulf %290, %266 : vector<8x32xf32>
    %293 = arith.mulf %289, %288 : vector<8x32xf32>
    %294 = arith.addf %292, %293 : vector<8x32xf32>
    %295 = math.tanh %294 : vector<8x32xf32>
    %296 = arith.mulf %291, %295 : vector<8x32xf32>
    %c0_i32_147 = arith.constant 0 : i32
    %297 = arith.addi %c0_i32_147, %c6_i32_140 : i32
    %c8_i32_148 = arith.constant 8 : i32
    %298 = arith.muli %297, %c8_i32_148 : i32
    %299 = tpu.assume_multiple %298, 8 : i32
    %300 = arith.index_cast %299 : i32 to index
    %c0_149 = arith.constant 0 : index
    %301 = vector.load %arg12[%300, %c0_149] : memref<64x32xf32, #tpu.memory_space<vmem>>, vector<8x32xf32>
    tpu.vector_store %arg12[%300, %c0_149], %296 {strides = array<i32>} : memref<64x32xf32, #tpu.memory_space<vmem>>, vector<8x32xf32>,
    %c7_i32_150 = arith.constant 7 : i32
    %c8_i32_151 = arith.constant 8 : i32
    %302 = arith.muli %c7_i32_150, %c8_i32_151 : i32
    %303 = tpu.assume_multiple %302, 8 : i32
    %304 = arith.index_cast %303 : i32 to index
    %c0_152 = arith.constant 0 : index
    %305 = vector.load %arg11[%304, %c0_152] : memref<64x128xf32, #tpu.memory_space<vmem>>, vector<8x128xf32>
    %c0_153 = arith.constant 0 : index
    %c0_154 = arith.constant 0 : index
    %306 = vector.load %arg3[%c0_153, %c0_154] : memref<32x128xf32, #tpu.memory_space<vmem>>, vector<32x128xf32>
    %cst_155 = arith.constant dense<0.000000e+00> : vector<8x128xf32>
    %307 = tpu.matmul %296, %306, %cst_155 {dimension_numbers = #tpu.dot_dimension_numbers<[1], [0], [0], [1], [0, 0, 1, 1], [], []>} : vector<8x32xf32>, vector<32x128xf32>, vector<8x128xf32> -> vector<8x128xf32>
    %308 = arith.addf %305, %307 : vector<8x128xf32>
    %309 = vector.extract_strided_slice %308 {offsets = [0, 0], sizes = [8, 96], strides = [1, 1]} : vector<8x128xf32> to vector<8x96xf32>
    %310 = arith.negf %309 : vector<8x96xf32>
    %311 = math.exp %310 : vector<8x96xf32>
    %cst_156 = arith.constant 1.000000e+00 : f32
    %312 = vector.broadcast %cst_156 : f32 to vector<8x96xf32>
    %313 = arith.addf %312, %311 : vector<8x96xf32>
    %314 = arith.divf %312, %313 : vector<8x96xf32>
    %315 = vector.extract_strided_slice %308 {offsets = [0, 96], sizes = [8, 32], strides = [1, 1]} : vector<8x128xf32> to vector<8x32xf32>
    %316 = math.tanh %315 : vector<8x32xf32>
    %317 = vector.extract_strided_slice %314 {offsets = [0, 0], sizes = [8, 32], strides = [1, 1]} : vector<8x96xf32> to vector<8x32xf32>
    %318 = vector.extract_strided_slice %314 {offsets = [0, 32], sizes = [8, 32], strides = [1, 1]} : vector<8x96xf32> to vector<8x32xf32>
    %319 = vector.extract_strided_slice %314 {offsets = [0, 64], sizes = [8, 32], strides = [1, 1]} : vector<8x96xf32> to vector<8x32xf32>
    %320 = arith.mulf %318, %294 : vector<8x32xf32>
    %321 = arith.mulf %317, %316 : vector<8x32xf32>
    %322 = arith.addf %320, %321 : vector<8x32xf32>
    %323 = math.tanh %322 : vector<8x32xf32>
    %324 = arith.mulf %319, %323 : vector<8x32xf32>
    %c0_i32_157 = arith.constant 0 : i32
    %325 = arith.addi %c0_i32_157, %c7_i32_150 : i32
    %c8_i32_158 = arith.constant 8 : i32
    %326 = arith.muli %325, %c8_i32_158 : i32
    %327 = tpu.assume_multiple %326, 8 : i32
    %328 = arith.index_cast %327 : i32 to index
    %c0_159 = arith.constant 0 : index
    %329 = vector.load %arg12[%328, %c0_159] : memref<64x32xf32, #tpu.memory_space<vmem>>, vector<8x32xf32>
    tpu.vector_store %arg12[%328, %c0_159], %324 {strides = array<i32>} : memref<64x32xf32, #tpu.memory_space<vmem>>, vector<8x32xf32>,
    %c8_i32_160 = arith.constant 8 : i32
    %cst_161 = arith.constant 0.000000e+00 : f32
    %330 = vector.broadcast %cst_161 : f32 to vector<8x32xf32>
    %cst_162 = arith.constant 0.000000e+00 : f32
    %331 = vector.broadcast %cst_162 : f32 to vector<8x32xf32>
    %c0_163 = arith.constant 0 : index
    %c0_164 = arith.constant 0 : index
    %332 = vector.load %arg12[%c0_163, %c0_164] : memref<64x32xf32, #tpu.memory_space<vmem>>, vector<64x32xf32>
    %c0_165 = arith.constant 0 : index
    %c0_166 = arith.constant 0 : index
    %333 = vector.load %arg5[%c0_165, %c0_166] : memref<32x128xf32, #tpu.memory_space<vmem>>, vector<32x128xf32>
    %cst_167 = arith.constant dense<0.000000e+00> : vector<64x128xf32>
    %334 = tpu.matmul %332, %333, %cst_167 {dimension_numbers = #tpu.dot_dimension_numbers<[1], [0], [0], [1], [0, 0, 1, 1], [], []>} : vector<64x32xf32>, vector<32x128xf32>, vector<64x128xf32> -> vector<64x128xf32>
    %c0_168 = arith.constant 0 : index
    %c0_169 = arith.constant 0 : index
    %335 = vector.load %arg7[%c0_168, %c0_169] : memref<1x128xf32, #tpu.memory_space<vmem>>, vector<1x128xf32>
    %336 = vector.broadcast %335 : vector<1x128xf32> to vector<64x128xf32>
    %337 = arith.addf %334, %336 : vector<64x128xf32>
    %c0_170 = arith.constant 0 : index
    %c0_171 = arith.constant 0 : index
    %338 = vector.load %arg11[%c0_170, %c0_171] : memref<64x128xf32, #tpu.memory_space<vmem>>, vector<64x128xf32>
    tpu.vector_store %arg11[%c0_170, %c0_171], %337 {strides = array<i32>} : memref<64x128xf32, #tpu.memory_space<vmem>>, vector<64x128xf32>,
    %c0_i32_172 = arith.constant 0 : i32
    %c8_i32_173 = arith.constant 8 : i32
    %339 = arith.muli %c0_i32_172, %c8_i32_173 : i32
    %340 = tpu.assume_multiple %339, 8 : i32
    %341 = arith.index_cast %340 : i32 to index
    %c0_174 = arith.constant 0 : index
    %342 = vector.load %arg11[%341, %c0_174] : memref<64x128xf32, #tpu.memory_space<vmem>>, vector<8x128xf32>
    %c0_175 = arith.constant 0 : index
    %c0_176 = arith.constant 0 : index
    %343 = vector.load %arg6[%c0_175, %c0_176] : memref<32x128xf32, #tpu.memory_space<vmem>>, vector<32x128xf32>
    %cst_177 = arith.constant dense<0.000000e+00> : vector<8x128xf32>
    %344 = tpu.matmul %330, %343, %cst_177 {dimension_numbers = #tpu.dot_dimension_numbers<[1], [0], [0], [1], [0, 0, 1, 1], [], []>} : vector<8x32xf32>, vector<32x128xf32>, vector<8x128xf32> -> vector<8x128xf32>
    %345 = arith.addf %342, %344 : vector<8x128xf32>
    %346 = vector.extract_strided_slice %345 {offsets = [0, 0], sizes = [8, 96], strides = [1, 1]} : vector<8x128xf32> to vector<8x96xf32>
    %347 = arith.negf %346 : vector<8x96xf32>
    %348 = math.exp %347 : vector<8x96xf32>
    %cst_178 = arith.constant 1.000000e+00 : f32
    %349 = vector.broadcast %cst_178 : f32 to vector<8x96xf32>
    %350 = arith.addf %349, %348 : vector<8x96xf32>
    %351 = arith.divf %349, %350 : vector<8x96xf32>
    %352 = vector.extract_strided_slice %345 {offsets = [0, 96], sizes = [8, 32], strides = [1, 1]} : vector<8x128xf32> to vector<8x32xf32>
    %353 = math.tanh %352 : vector<8x32xf32>
    %354 = vector.extract_strided_slice %351 {offsets = [0, 0], sizes = [8, 32], strides = [1, 1]} : vector<8x96xf32> to vector<8x32xf32>
    %355 = vector.extract_strided_slice %351 {offsets = [0, 32], sizes = [8, 32], strides = [1, 1]} : vector<8x96xf32> to vector<8x32xf32>
    %356 = vector.extract_strided_slice %351 {offsets = [0, 64], sizes = [8, 32], strides = [1, 1]} : vector<8x96xf32> to vector<8x32xf32>
    %357 = arith.mulf %355, %331 : vector<8x32xf32>
    %358 = arith.mulf %354, %353 : vector<8x32xf32>
    %359 = arith.addf %357, %358 : vector<8x32xf32>
    %360 = math.tanh %359 : vector<8x32xf32>
    %361 = arith.mulf %356, %360 : vector<8x32xf32>
    %c1_i32_179 = arith.constant 1 : i32
    %c8_i32_180 = arith.constant 8 : i32
    %362 = arith.muli %c1_i32_179, %c8_i32_180 : i32
    %363 = tpu.assume_multiple %362, 8 : i32
    %364 = arith.index_cast %363 : i32 to index
    %c0_181 = arith.constant 0 : index
    %365 = vector.load %arg11[%364, %c0_181] : memref<64x128xf32, #tpu.memory_space<vmem>>, vector<8x128xf32>
    %c0_182 = arith.constant 0 : index
    %c0_183 = arith.constant 0 : index
    %366 = vector.load %arg6[%c0_182, %c0_183] : memref<32x128xf32, #tpu.memory_space<vmem>>, vector<32x128xf32>
    %cst_184 = arith.constant dense<0.000000e+00> : vector<8x128xf32>
    %367 = tpu.matmul %361, %366, %cst_184 {dimension_numbers = #tpu.dot_dimension_numbers<[1], [0], [0], [1], [0, 0, 1, 1], [], []>} : vector<8x32xf32>, vector<32x128xf32>, vector<8x128xf32> -> vector<8x128xf32>
    %368 = arith.addf %365, %367 : vector<8x128xf32>
    %369 = vector.extract_strided_slice %368 {offsets = [0, 0], sizes = [8, 96], strides = [1, 1]} : vector<8x128xf32> to vector<8x96xf32>
    %370 = arith.negf %369 : vector<8x96xf32>
    %371 = math.exp %370 : vector<8x96xf32>
    %cst_185 = arith.constant 1.000000e+00 : f32
    %372 = vector.broadcast %cst_185 : f32 to vector<8x96xf32>
    %373 = arith.addf %372, %371 : vector<8x96xf32>
    %374 = arith.divf %372, %373 : vector<8x96xf32>
    %375 = vector.extract_strided_slice %368 {offsets = [0, 96], sizes = [8, 32], strides = [1, 1]} : vector<8x128xf32> to vector<8x32xf32>
    %376 = math.tanh %375 : vector<8x32xf32>
    %377 = vector.extract_strided_slice %374 {offsets = [0, 0], sizes = [8, 32], strides = [1, 1]} : vector<8x96xf32> to vector<8x32xf32>
    %378 = vector.extract_strided_slice %374 {offsets = [0, 32], sizes = [8, 32], strides = [1, 1]} : vector<8x96xf32> to vector<8x32xf32>
    %379 = vector.extract_strided_slice %374 {offsets = [0, 64], sizes = [8, 32], strides = [1, 1]} : vector<8x96xf32> to vector<8x32xf32>
    %380 = arith.mulf %378, %359 : vector<8x32xf32>
    %381 = arith.mulf %377, %376 : vector<8x32xf32>
    %382 = arith.addf %380, %381 : vector<8x32xf32>
    %383 = math.tanh %382 : vector<8x32xf32>
    %384 = arith.mulf %379, %383 : vector<8x32xf32>
    %c2_i32_186 = arith.constant 2 : i32
    %c8_i32_187 = arith.constant 8 : i32
    %385 = arith.muli %c2_i32_186, %c8_i32_187 : i32
    %386 = tpu.assume_multiple %385, 8 : i32
    %387 = arith.index_cast %386 : i32 to index
    %c0_188 = arith.constant 0 : index
    %388 = vector.load %arg11[%387, %c0_188] : memref<64x128xf32, #tpu.memory_space<vmem>>, vector<8x128xf32>
    %c0_189 = arith.constant 0 : index
    %c0_190 = arith.constant 0 : index
    %389 = vector.load %arg6[%c0_189, %c0_190] : memref<32x128xf32, #tpu.memory_space<vmem>>, vector<32x128xf32>
    %cst_191 = arith.constant dense<0.000000e+00> : vector<8x128xf32>
    %390 = tpu.matmul %384, %389, %cst_191 {dimension_numbers = #tpu.dot_dimension_numbers<[1], [0], [0], [1], [0, 0, 1, 1], [], []>} : vector<8x32xf32>, vector<32x128xf32>, vector<8x128xf32> -> vector<8x128xf32>
    %391 = arith.addf %388, %390 : vector<8x128xf32>
    %392 = vector.extract_strided_slice %391 {offsets = [0, 0], sizes = [8, 96], strides = [1, 1]} : vector<8x128xf32> to vector<8x96xf32>
    %393 = arith.negf %392 : vector<8x96xf32>
    %394 = math.exp %393 : vector<8x96xf32>
    %cst_192 = arith.constant 1.000000e+00 : f32
    %395 = vector.broadcast %cst_192 : f32 to vector<8x96xf32>
    %396 = arith.addf %395, %394 : vector<8x96xf32>
    %397 = arith.divf %395, %396 : vector<8x96xf32>
    %398 = vector.extract_strided_slice %391 {offsets = [0, 96], sizes = [8, 32], strides = [1, 1]} : vector<8x128xf32> to vector<8x32xf32>
    %399 = math.tanh %398 : vector<8x32xf32>
    %400 = vector.extract_strided_slice %397 {offsets = [0, 0], sizes = [8, 32], strides = [1, 1]} : vector<8x96xf32> to vector<8x32xf32>
    %401 = vector.extract_strided_slice %397 {offsets = [0, 32], sizes = [8, 32], strides = [1, 1]} : vector<8x96xf32> to vector<8x32xf32>
    %402 = vector.extract_strided_slice %397 {offsets = [0, 64], sizes = [8, 32], strides = [1, 1]} : vector<8x96xf32> to vector<8x32xf32>
    %403 = arith.mulf %401, %382 : vector<8x32xf32>
    %404 = arith.mulf %400, %399 : vector<8x32xf32>
    %405 = arith.addf %403, %404 : vector<8x32xf32>
    %406 = math.tanh %405 : vector<8x32xf32>
    %407 = arith.mulf %402, %406 : vector<8x32xf32>
    %c3_i32_193 = arith.constant 3 : i32
    %c8_i32_194 = arith.constant 8 : i32
    %408 = arith.muli %c3_i32_193, %c8_i32_194 : i32
    %409 = tpu.assume_multiple %408, 8 : i32
    %410 = arith.index_cast %409 : i32 to index
    %c0_195 = arith.constant 0 : index
    %411 = vector.load %arg11[%410, %c0_195] : memref<64x128xf32, #tpu.memory_space<vmem>>, vector<8x128xf32>
    %c0_196 = arith.constant 0 : index
    %c0_197 = arith.constant 0 : index
    %412 = vector.load %arg6[%c0_196, %c0_197] : memref<32x128xf32, #tpu.memory_space<vmem>>, vector<32x128xf32>
    %cst_198 = arith.constant dense<0.000000e+00> : vector<8x128xf32>
    %413 = tpu.matmul %407, %412, %cst_198 {dimension_numbers = #tpu.dot_dimension_numbers<[1], [0], [0], [1], [0, 0, 1, 1], [], []>} : vector<8x32xf32>, vector<32x128xf32>, vector<8x128xf32> -> vector<8x128xf32>
    %414 = arith.addf %411, %413 : vector<8x128xf32>
    %415 = vector.extract_strided_slice %414 {offsets = [0, 0], sizes = [8, 96], strides = [1, 1]} : vector<8x128xf32> to vector<8x96xf32>
    %416 = arith.negf %415 : vector<8x96xf32>
    %417 = math.exp %416 : vector<8x96xf32>
    %cst_199 = arith.constant 1.000000e+00 : f32
    %418 = vector.broadcast %cst_199 : f32 to vector<8x96xf32>
    %419 = arith.addf %418, %417 : vector<8x96xf32>
    %420 = arith.divf %418, %419 : vector<8x96xf32>
    %421 = vector.extract_strided_slice %414 {offsets = [0, 96], sizes = [8, 32], strides = [1, 1]} : vector<8x128xf32> to vector<8x32xf32>
    %422 = math.tanh %421 : vector<8x32xf32>
    %423 = vector.extract_strided_slice %420 {offsets = [0, 0], sizes = [8, 32], strides = [1, 1]} : vector<8x96xf32> to vector<8x32xf32>
    %424 = vector.extract_strided_slice %420 {offsets = [0, 32], sizes = [8, 32], strides = [1, 1]} : vector<8x96xf32> to vector<8x32xf32>
    %425 = vector.extract_strided_slice %420 {offsets = [0, 64], sizes = [8, 32], strides = [1, 1]} : vector<8x96xf32> to vector<8x32xf32>
    %426 = arith.mulf %424, %405 : vector<8x32xf32>
    %427 = arith.mulf %423, %422 : vector<8x32xf32>
    %428 = arith.addf %426, %427 : vector<8x32xf32>
    %429 = math.tanh %428 : vector<8x32xf32>
    %430 = arith.mulf %425, %429 : vector<8x32xf32>
    %c4_i32_200 = arith.constant 4 : i32
    %c8_i32_201 = arith.constant 8 : i32
    %431 = arith.muli %c4_i32_200, %c8_i32_201 : i32
    %432 = tpu.assume_multiple %431, 8 : i32
    %433 = arith.index_cast %432 : i32 to index
    %c0_202 = arith.constant 0 : index
    %434 = vector.load %arg11[%433, %c0_202] : memref<64x128xf32, #tpu.memory_space<vmem>>, vector<8x128xf32>
    %c0_203 = arith.constant 0 : index
    %c0_204 = arith.constant 0 : index
    %435 = vector.load %arg6[%c0_203, %c0_204] : memref<32x128xf32, #tpu.memory_space<vmem>>, vector<32x128xf32>
    %cst_205 = arith.constant dense<0.000000e+00> : vector<8x128xf32>
    %436 = tpu.matmul %430, %435, %cst_205 {dimension_numbers = #tpu.dot_dimension_numbers<[1], [0], [0], [1], [0, 0, 1, 1], [], []>} : vector<8x32xf32>, vector<32x128xf32>, vector<8x128xf32> -> vector<8x128xf32>
    %437 = arith.addf %434, %436 : vector<8x128xf32>
    %438 = vector.extract_strided_slice %437 {offsets = [0, 0], sizes = [8, 96], strides = [1, 1]} : vector<8x128xf32> to vector<8x96xf32>
    %439 = arith.negf %438 : vector<8x96xf32>
    %440 = math.exp %439 : vector<8x96xf32>
    %cst_206 = arith.constant 1.000000e+00 : f32
    %441 = vector.broadcast %cst_206 : f32 to vector<8x96xf32>
    %442 = arith.addf %441, %440 : vector<8x96xf32>
    %443 = arith.divf %441, %442 : vector<8x96xf32>
    %444 = vector.extract_strided_slice %437 {offsets = [0, 96], sizes = [8, 32], strides = [1, 1]} : vector<8x128xf32> to vector<8x32xf32>
    %445 = math.tanh %444 : vector<8x32xf32>
    %446 = vector.extract_strided_slice %443 {offsets = [0, 0], sizes = [8, 32], strides = [1, 1]} : vector<8x96xf32> to vector<8x32xf32>
    %447 = vector.extract_strided_slice %443 {offsets = [0, 32], sizes = [8, 32], strides = [1, 1]} : vector<8x96xf32> to vector<8x32xf32>
    %448 = vector.extract_strided_slice %443 {offsets = [0, 64], sizes = [8, 32], strides = [1, 1]} : vector<8x96xf32> to vector<8x32xf32>
    %449 = arith.mulf %447, %428 : vector<8x32xf32>
    %450 = arith.mulf %446, %445 : vector<8x32xf32>
    %451 = arith.addf %449, %450 : vector<8x32xf32>
    %452 = math.tanh %451 : vector<8x32xf32>
    %453 = arith.mulf %448, %452 : vector<8x32xf32>
    %c5_i32_207 = arith.constant 5 : i32
    %c8_i32_208 = arith.constant 8 : i32
    %454 = arith.muli %c5_i32_207, %c8_i32_208 : i32
    %455 = tpu.assume_multiple %454, 8 : i32
    %456 = arith.index_cast %455 : i32 to index
    %c0_209 = arith.constant 0 : index
    %457 = vector.load %arg11[%456, %c0_209] : memref<64x128xf32, #tpu.memory_space<vmem>>, vector<8x128xf32>
    %c0_210 = arith.constant 0 : index
    %c0_211 = arith.constant 0 : index
    %458 = vector.load %arg6[%c0_210, %c0_211] : memref<32x128xf32, #tpu.memory_space<vmem>>, vector<32x128xf32>
    %cst_212 = arith.constant dense<0.000000e+00> : vector<8x128xf32>
    %459 = tpu.matmul %453, %458, %cst_212 {dimension_numbers = #tpu.dot_dimension_numbers<[1], [0], [0], [1], [0, 0, 1, 1], [], []>} : vector<8x32xf32>, vector<32x128xf32>, vector<8x128xf32> -> vector<8x128xf32>
    %460 = arith.addf %457, %459 : vector<8x128xf32>
    %461 = vector.extract_strided_slice %460 {offsets = [0, 0], sizes = [8, 96], strides = [1, 1]} : vector<8x128xf32> to vector<8x96xf32>
    %462 = arith.negf %461 : vector<8x96xf32>
    %463 = math.exp %462 : vector<8x96xf32>
    %cst_213 = arith.constant 1.000000e+00 : f32
    %464 = vector.broadcast %cst_213 : f32 to vector<8x96xf32>
    %465 = arith.addf %464, %463 : vector<8x96xf32>
    %466 = arith.divf %464, %465 : vector<8x96xf32>
    %467 = vector.extract_strided_slice %460 {offsets = [0, 96], sizes = [8, 32], strides = [1, 1]} : vector<8x128xf32> to vector<8x32xf32>
    %468 = math.tanh %467 : vector<8x32xf32>
    %469 = vector.extract_strided_slice %466 {offsets = [0, 0], sizes = [8, 32], strides = [1, 1]} : vector<8x96xf32> to vector<8x32xf32>
    %470 = vector.extract_strided_slice %466 {offsets = [0, 32], sizes = [8, 32], strides = [1, 1]} : vector<8x96xf32> to vector<8x32xf32>
    %471 = vector.extract_strided_slice %466 {offsets = [0, 64], sizes = [8, 32], strides = [1, 1]} : vector<8x96xf32> to vector<8x32xf32>
    %472 = arith.mulf %470, %451 : vector<8x32xf32>
    %473 = arith.mulf %469, %468 : vector<8x32xf32>
    %474 = arith.addf %472, %473 : vector<8x32xf32>
    %475 = math.tanh %474 : vector<8x32xf32>
    %476 = arith.mulf %471, %475 : vector<8x32xf32>
    %c6_i32_214 = arith.constant 6 : i32
    %c8_i32_215 = arith.constant 8 : i32
    %477 = arith.muli %c6_i32_214, %c8_i32_215 : i32
    %478 = tpu.assume_multiple %477, 8 : i32
    %479 = arith.index_cast %478 : i32 to index
    %c0_216 = arith.constant 0 : index
    %480 = vector.load %arg11[%479, %c0_216] : memref<64x128xf32, #tpu.memory_space<vmem>>, vector<8x128xf32>
    %c0_217 = arith.constant 0 : index
    %c0_218 = arith.constant 0 : index
    %481 = vector.load %arg6[%c0_217, %c0_218] : memref<32x128xf32, #tpu.memory_space<vmem>>, vector<32x128xf32>
    %cst_219 = arith.constant dense<0.000000e+00> : vector<8x128xf32>
    %482 = tpu.matmul %476, %481, %cst_219 {dimension_numbers = #tpu.dot_dimension_numbers<[1], [0], [0], [1], [0, 0, 1, 1], [], []>} : vector<8x32xf32>, vector<32x128xf32>, vector<8x128xf32> -> vector<8x128xf32>
    %483 = arith.addf %480, %482 : vector<8x128xf32>
    %484 = vector.extract_strided_slice %483 {offsets = [0, 0], sizes = [8, 96], strides = [1, 1]} : vector<8x128xf32> to vector<8x96xf32>
    %485 = arith.negf %484 : vector<8x96xf32>
    %486 = math.exp %485 : vector<8x96xf32>
    %cst_220 = arith.constant 1.000000e+00 : f32
    %487 = vector.broadcast %cst_220 : f32 to vector<8x96xf32>
    %488 = arith.addf %487, %486 : vector<8x96xf32>
    %489 = arith.divf %487, %488 : vector<8x96xf32>
    %490 = vector.extract_strided_slice %483 {offsets = [0, 96], sizes = [8, 32], strides = [1, 1]} : vector<8x128xf32> to vector<8x32xf32>
    %491 = math.tanh %490 : vector<8x32xf32>
    %492 = vector.extract_strided_slice %489 {offsets = [0, 0], sizes = [8, 32], strides = [1, 1]} : vector<8x96xf32> to vector<8x32xf32>
    %493 = vector.extract_strided_slice %489 {offsets = [0, 32], sizes = [8, 32], strides = [1, 1]} : vector<8x96xf32> to vector<8x32xf32>
    %494 = vector.extract_strided_slice %489 {offsets = [0, 64], sizes = [8, 32], strides = [1, 1]} : vector<8x96xf32> to vector<8x32xf32>
    %495 = arith.mulf %493, %474 : vector<8x32xf32>
    %496 = arith.mulf %492, %491 : vector<8x32xf32>
    %497 = arith.addf %495, %496 : vector<8x32xf32>
    %498 = math.tanh %497 : vector<8x32xf32>
    %499 = arith.mulf %494, %498 : vector<8x32xf32>
    %c7_i32_221 = arith.constant 7 : i32
    %c8_i32_222 = arith.constant 8 : i32
    %500 = arith.muli %c7_i32_221, %c8_i32_222 : i32
    %501 = tpu.assume_multiple %500, 8 : i32
    %502 = arith.index_cast %501 : i32 to index
    %c0_223 = arith.constant 0 : index
    %503 = vector.load %arg11[%502, %c0_223] : memref<64x128xf32, #tpu.memory_space<vmem>>, vector<8x128xf32>
    %c0_224 = arith.constant 0 : index
    %c0_225 = arith.constant 0 : index
    %504 = vector.load %arg6[%c0_224, %c0_225] : memref<32x128xf32, #tpu.memory_space<vmem>>, vector<32x128xf32>
    %cst_226 = arith.constant dense<0.000000e+00> : vector<8x128xf32>
    %505 = tpu.matmul %499, %504, %cst_226 {dimension_numbers = #tpu.dot_dimension_numbers<[1], [0], [0], [1], [0, 0, 1, 1], [], []>} : vector<8x32xf32>, vector<32x128xf32>, vector<8x128xf32> -> vector<8x128xf32>
    %506 = arith.addf %503, %505 : vector<8x128xf32>
    %507 = vector.extract_strided_slice %506 {offsets = [0, 0], sizes = [8, 96], strides = [1, 1]} : vector<8x128xf32> to vector<8x96xf32>
    %508 = arith.negf %507 : vector<8x96xf32>
    %509 = math.exp %508 : vector<8x96xf32>
    %cst_227 = arith.constant 1.000000e+00 : f32
    %510 = vector.broadcast %cst_227 : f32 to vector<8x96xf32>
    %511 = arith.addf %510, %509 : vector<8x96xf32>
    %512 = arith.divf %510, %511 : vector<8x96xf32>
    %513 = vector.extract_strided_slice %506 {offsets = [0, 96], sizes = [8, 32], strides = [1, 1]} : vector<8x128xf32> to vector<8x32xf32>
    %514 = math.tanh %513 : vector<8x32xf32>
    %515 = vector.extract_strided_slice %512 {offsets = [0, 0], sizes = [8, 32], strides = [1, 1]} : vector<8x96xf32> to vector<8x32xf32>
    %516 = vector.extract_strided_slice %512 {offsets = [0, 32], sizes = [8, 32], strides = [1, 1]} : vector<8x96xf32> to vector<8x32xf32>
    %517 = vector.extract_strided_slice %512 {offsets = [0, 64], sizes = [8, 32], strides = [1, 1]} : vector<8x96xf32> to vector<8x32xf32>
    %518 = arith.mulf %516, %497 : vector<8x32xf32>
    %519 = arith.mulf %515, %514 : vector<8x32xf32>
    %520 = arith.addf %518, %519 : vector<8x32xf32>
    %521 = math.tanh %520 : vector<8x32xf32>
    %522 = arith.mulf %517, %521 : vector<8x32xf32>
    %c8_i32_228 = arith.constant 8 : i32
    %c0_229 = arith.constant 0 : index
    %c0_230 = arith.constant 0 : index
    %523 = vector.load %arg8[%c0_229, %c0_230] : memref<32x128xf32, #tpu.memory_space<vmem>>, vector<32x128xf32>
    %cst_231 = arith.constant dense<0.000000e+00> : vector<8x128xf32>
    %524 = tpu.matmul %522, %523, %cst_231 {dimension_numbers = #tpu.dot_dimension_numbers<[1], [0], [0], [1], [0, 0, 1, 1], [], []>} : vector<8x32xf32>, vector<32x128xf32>, vector<8x128xf32> -> vector<8x128xf32>
    %c0_232 = arith.constant 0 : index
    %c0_233 = arith.constant 0 : index
    %525 = vector.load %arg9[%c0_232, %c0_233] : memref<1x128xf32, #tpu.memory_space<vmem>>, vector<1x128xf32>
    %526 = vector.broadcast %525 : vector<1x128xf32> to vector<8x128xf32>
    %527 = arith.addf %524, %526 : vector<8x128xf32>
    %528 = arith.negf %527 : vector<8x128xf32>
    %529 = math.exp %528 : vector<8x128xf32>
    %cst_234 = arith.constant 1.000000e+00 : f32
    %530 = vector.broadcast %cst_234 : f32 to vector<8x128xf32>
    %531 = arith.addf %530, %529 : vector<8x128xf32>
    %532 = arith.divf %530, %531 : vector<8x128xf32>
    %c0_235 = arith.constant 0 : index
    %c0_236 = arith.constant 0 : index
    %533 = vector.load %arg10[%c0_235, %c0_236] : memref<8x128xf32, #tpu.memory_space<vmem>>, vector<8x128xf32>
    tpu.vector_store %arg10[%c0_235, %c0_236], %532 {strides = array<i32>} : memref<8x128xf32, #tpu.memory_space<vmem>>, vector<8x128xf32>,
    return
  }
  func.func @transform_0(%arg0: i32) -> (i32, i32, i32) {
    %c0_i32 = arith.constant 0 : i32
    %c0_i32_0 = arith.constant 0 : i32
    %c0_i32_1 = arith.constant 0 : i32
    return %c0_i32, %arg0, %c0_i32_0 : i32, i32, i32
  }
  func.func @transform_1(%arg0: i32) -> (i32, i32) {
    %c0_i32 = arith.constant 0 : i32
    %c0_i32_0 = arith.constant 0 : i32
    %c0_i32_1 = arith.constant 0 : i32
    return %c0_i32, %c0_i32_0 : i32, i32
  }
  func.func @transform_2(%arg0: i32) -> (i32, i32) {
    %c0_i32 = arith.constant 0 : i32
    %c0_i32_0 = arith.constant 0 : i32
    %c0_i32_1 = arith.constant 0 : i32
    return %c0_i32, %c0_i32_0 : i32, i32
  }
  func.func @transform_3(%arg0: i32) -> (i32, i32) {
    %c0_i32 = arith.constant 0 : i32
    %c0_i32_0 = arith.constant 0 : i32
    %c0_i32_1 = arith.constant 0 : i32
    return %c0_i32, %c0_i32_0 : i32, i32
  }
  func.func @transform_4(%arg0: i32) -> (i32, i32) {
    %c0_i32 = arith.constant 0 : i32
    %c0_i32_0 = arith.constant 0 : i32
    %c0_i32_1 = arith.constant 0 : i32
    return %c0_i32, %c0_i32_0 : i32, i32
  }
  func.func @transform_5(%arg0: i32) -> (i32, i32) {
    %c0_i32 = arith.constant 0 : i32
    %c0_i32_0 = arith.constant 0 : i32
    %c0_i32_1 = arith.constant 0 : i32
    return %c0_i32, %c0_i32_0 : i32, i32
  }
  func.func @transform_6(%arg0: i32) -> (i32, i32) {
    %c0_i32 = arith.constant 0 : i32
    %c0_i32_0 = arith.constant 0 : i32
    %c0_i32_1 = arith.constant 0 : i32
    return %c0_i32, %c0_i32_0 : i32, i32
  }
  func.func @transform_7(%arg0: i32) -> (i32, i32) {
    %c0_i32 = arith.constant 0 : i32
    %c0_i32_0 = arith.constant 0 : i32
    %c0_i32_1 = arith.constant 0 : i32
    return %c0_i32, %c0_i32_0 : i32, i32
  }
  func.func @transform_8(%arg0: i32) -> (i32, i32) {
    %c0_i32 = arith.constant 0 : i32
    %c0_i32_0 = arith.constant 0 : i32
    %c0_i32_1 = arith.constant 0 : i32
    return %c0_i32, %c0_i32_0 : i32, i32
  }
  func.func @transform_9(%arg0: i32) -> (i32, i32) {
    %c0_i32 = arith.constant 0 : i32
    %c0_i32_0 = arith.constant 0 : i32
    return %arg0, %c0_i32 : i32, i32
  }
}

</mosaic_0001>

<bundles_post_ra>
// kernel: lstm_model_forward.1
= control target key start
LH: loop header
LB: loop body
LE: loop exit
PB: predicated region body
PF: predicated region fallthrough
CT: control target
= control target key end

     0   :  { %v3229_v0 = vmov 0.0   ;;  %vm3230_vm0 = vmmov 0   ;;  %vm42_vm1 = vcmask 130048   ;;  %s3231_s29 = smov 32   ;;  %vm724_vm2 = vcmask 261120   ;;  %s3773_s1 = inlined_call_operand.vmem [shape: f32[16,128], index: 1, kind: input, shape index: {}]   ;;  %s3774_s0 = inlined_call_operand.vmem [shape: f32[8,8,16], index: 0, kind: input, shape index: {}]   ;;  %s3775_s2 = inlined_call_operand.vmem [shape: f32[32,128], index: 2, kind: input, shape index: {}]   ;;  %s3776_s3 = inlined_call_operand.vmem [shape: f32[1,128], index: 3, kind: input, shape index: {}]   ;;  %s3777_s4 = inlined_call_operand.vmem [shape: f32[32,128], index: 4, kind: input, shape index: {}]   ;;  %s3778_s5 = inlined_call_operand.vmem [shape: f32[32,128], index: 5, kind: input, shape index: {}]   ;;  %s3779_s6 = inlined_call_operand.vmem [shape: f32[1,128], index: 6, kind: input, shape index: {}]   ;;  %s3780_s7 = inlined_call_operand.vmem [shape: f32[32,128], index: 7, kind: input, shape index: {}]   ;;  %s3781_s8 = inlined_call_operand.vmem [shape: f32[1,128], index: 8, kind: input, shape index: {}]   ;;  %s3782_s9 = inlined_call_operand.vmem [shape: f32[8,128], index: 9, kind: output, shape index: {}]  }
   0x1   :  { %2844 = vmatprep.subr.mxu0 %v3229_v0  ;;  %v3287_v1 = vld [vmem:[%s3773_s1 + $0x8] sm:$0xff]  ;;  %v3292_v2 = vld [vmem:[%s3773_s1] sm:$0xff]  ;;  %2848 = vmatprep.mubr.msk.f32.mxu0 %vm3230_vm0, %v3229_v0  ;;  %v2649_v3 = vld [vmem:[%s3774_s0 + $0x10] sm:$0xff] }
   0x2   :  { %2845 = vmatpush3.msra.mxu0 %v3287_v1  ;;  %2830 = vmatprep.subr.mxu1 %v3229_v0  ;;  %v2655_v4 = vld [vmem:[%s3774_s0 + $0x20] sm:$0xff]  ;;  %v2661_v6 = vld [vmem:[%s3774_s0 + $0x30] sm:$0xff]  ;;  %v3333_v7 = vld [vmem:[%s3775_s2 + $0x18] sm:$0xff] }
   0x3   :  { %2846 = vmatprep.subr.mxu0 %v3229_v0  ;;  %2831 = vmatpush3.msra.mxu1 %v3287_v1  ;;  %v32_v5 = vld [vmem:[%s3774_s0] sm:$0xff]  ;;  %v3343_v8 = vld [vmem:[%s3775_s2 + $0x10] sm:$0xff]  ;;  %v3352_v9 = vld [vmem:[%s3775_s2 + $0x8] sm:$0xff] }
   0x4   :  { %2847 = vmatpush3.msra.mxu0 %v3292_v2  ;;  %2832 = vmatprep.subr.mxu1 %v3229_v0  ;;  %v3361_v10 = vld [vmem:[%s3775_s2] sm:$0xff]  ;;  %v2646_v34 = vld [vmem:[%s3774_s0 + $0x8] sm:$0xff]  ;;  %v2652_v35 = vld [vmem:[%s3774_s0 + $0x18] sm:$0xff] }
   0x5   :  { %2849 = vmatmul.mubr.msk.f32.vlgmr.msra.gmra.mxu0 %vm42_vm1, %v2649_v3  ;;  %2858 = vmatprep.subr.mxu0 %v3229_v0  ;;  %v3391_v19 = vld [vmem:[%s3776_s3] ss:$0 sm:$0xff]  ;;  %v2658_v36 = vld [vmem:[%s3774_s0 + $0x28] sm:$0xff]  ;;  %v2664_v38 = vld [vmem:[%s3774_s0 + $0x38] sm:$0xff]  ;;  %s3232_s0 = smov 64  }
   0x6   :  { %2859 = vmatpush3.msra.mxu0 %v3287_v1  ;;  %2862 = vmatprep.mubr.msk.f32.mxu0 %vm3230_vm0, %v3229_v0 }
   0x7   :  { %2860 = vmatprep.subr.mxu0 %v3229_v0  ;;  %2833 = vmatpush3.msra.mxu1 %v3292_v2 }
   0x8   :  { %2861 = vmatpush3.msra.mxu0 %v3292_v2  ;;  %2834 = vmatprep.mubr.msk.f32.mxu1 %vm3230_vm0, %v3229_v0 }
   0x9   :  { %2863 = vmatmul.mubr.msk.f32.vlgmr.msra.gmra.mxu0 %vm42_vm1, %v2655_v4  ;;  %2872 = vmatprep.subr.mxu0 %v3229_v0 }
   0xa   :  { %2873 = vmatpush3.msra.mxu0 %v3287_v1  ;;  %2876 = vmatprep.mubr.msk.f32.mxu0 %vm3230_vm0, %v3229_v0 }
   0xb   :  { %2874 = vmatprep.subr.mxu0 %v3229_v0  ;;  %2835 = vmatmul.mubr.msk.f32.vlgmr.msra.gmra.mxu1 %vm42_vm1, %v32_v5 }
   0xc   :  { %2875 = vmatpush3.msra.mxu0 %v3292_v2  ;;  %2837 = vmatprep.subr.mxu1 %v3229_v0 }
   0xd   :  { %2877 = vmatmul.mubr.msk.f32.vlgmr.msra.gmra.mxu0 %vm42_vm1, %v2661_v6  ;;  %2886 = vmatprep.subr.mxu0 %v3229_v0 }
   0xe   :  { %2887 = vmatpush3.msra.mxu0 %v3333_v7  ;;  %2894 = vmatprep.mubr.msk.f32.mxu0 %vm3230_vm0, %v3229_v0 }
   0xf   :  { %2888 = vmatprep.subr.mxu0 %v3229_v0  ;;  %2838 = vmatpush3.msra.mxu1 %v3287_v1 }
  0x10   :  { %2889 = vmatpush3.msra.mxu0 %v3343_v8  ;;  %2839 = vmatprep.subr.mxu1 %v3229_v0 }
  0x11   :  { %2890 = vmatprep.subr.mxu0 %v3229_v0  ;;  %2840 = vmatpush3.msra.mxu1 %v3292_v2 }
  0x12   :  { %2891 = vmatpush3.msra.mxu0 %v3352_v9  ;;  %2841 = vmatprep.mubr.msk.f32.mxu1 %vm3230_vm0, %v3229_v0 }
  0x13   :  { %2892 = vmatprep.subr.mxu0 %v3229_v0  ;;  %2851 = vmatprep.subr.mxu1 %v3229_v0 }
  0x14   :  { %2893 = vmatpush3.msra.mxu0 %v3361_v10  ;;  %2842 = vmatmul.mubr.msk.f32.vlgmr.msra.gmra.mxu1 %vm42_vm1, %v2646_v34 }
  0x15   :  { %2895 = vmatmul.mubr.f32.vlgmr.msra.gmra.mxu0 %v3229_v0  ;;  %2908 = vmatprep.subr.mxu0 %v3229_v0 }
  0x16   :  { %2909 = vmatpush3.msra.mxu0 %v3333_v7  ;;  %2916 = vmatprep.mubr.msk.f32.mxu0 %vm3230_vm0, %v3229_v0 }
  0x17   :  { %2910 = vmatprep.subr.mxu0 %v3229_v0  ;;  %2852 = vmatpush3.msra.mxu1 %v3287_v1 }
  0x18   :  { %2911 = vmatpush3.msra.mxu0 %v3343_v8  ;;  %2855 = vmatprep.mubr.msk.f32.mxu1 %vm3230_vm0, %v3229_v0 }
  0x19   :  { %2912 = vmatprep.subr.mxu0 %v3229_v0  ;;  %2853 = vmatprep.subr.mxu1 %v3229_v0 }
  0x1a   :  { %2913 = vmatpush3.msra.mxu0 %v3352_v9  ;;  %2854 = vmatpush3.msra.mxu1 %v3292_v2 }
  0x1b   :  { %2914 = vmatprep.subr.mxu0 %v3229_v0  ;;  %2856 = vmatmul.mubr.msk.f32.vlgmr.msra.gmra.mxu1 %vm42_vm1, %v2652_v35 }
  0x1c   :  { %2915 = vmatpush3.msra.mxu0 %v3361_v10  ;;  %2865 = vmatprep.subr.mxu1 %v3229_v0 }
  0x1d   :  { %2930 = vmatprep.subr.mxu0 %v3229_v0  ;;  %2866 = vmatpush3.msra.mxu1 %v3287_v1 }
  0x1e   :  { %2869 = vmatprep.mubr.msk.f32.mxu1 %vm3230_vm0, %v3229_v0  ;;  %2867 = vmatprep.subr.mxu1 %v3229_v0 }
  0x1f   :  { %2868 = vmatpush3.msra.mxu1 %v3292_v2 }
  0x20   :  { %2870 = vmatmul.mubr.msk.f32.vlgmr.msra.gmra.mxu1 %vm42_vm1, %v2658_v36  ;;  %2879 = vmatprep.subr.mxu1 %v3229_v0 }
  0x21   :  { %2880 = vmatpush3.msra.mxu1 %v3287_v1  ;;  %2883 = vmatprep.mubr.msk.f32.mxu1 %vm3230_vm0, %v3229_v0 }
  0x22   :  { %2881 = vmatprep.subr.mxu1 %v3229_v0 }
  0x23   :  { %2882 = vmatpush3.msra.mxu1 %v3292_v2 }
  0x24   :  { %2884 = vmatmul.mubr.msk.f32.vlgmr.msra.gmra.mxu1 %vm42_vm1, %v2664_v38  ;;  %2897 = vmatprep.subr.mxu1 %v3229_v0 }
  0x25   :  { %2898 = vmatpush3.msra.mxu1 %v3333_v7  ;;  %2905 = vmatprep.mubr.msk.f32.mxu1 %vm3230_vm0, %v3229_v0 }
  0x26   :  { %2899 = vmatprep.subr.mxu1 %v3229_v0 }
  0x27   :  { %2900 = vmatpush3.msra.mxu1 %v3343_v8 }
  0x28   :  { %2901 = vmatprep.subr.mxu1 %v3229_v0 }
  0x29   :  { %2902 = vmatpush3.msra.mxu1 %v3352_v9 }
  0x2a   :  { %2903 = vmatprep.subr.mxu1 %v3229_v0 }
  0x2b   :  { %2904 = vmatpush3.msra.mxu1 %v3361_v10 }
  0x2c   :  { %2919 = vmatprep.subr.mxu1 %v3229_v0 }
  0xc5   :  { %v3382_v11 = vpop.f32.mrf.mxu0 }
  0xc6   :  { %v284_v5 = vadd.f32 %v3391_v19, %v3382_v11 }
  0xc7   :  { %v2850_v12 = vpop.f32.mrf.mxu0 }
  0xc9   :  { %v3384_v13 = vpop.f32.mrf.mxu0 }
  0xcb   :  { %v2864_v14 = vpop.f32.mrf.mxu0  ;;  %v112_v15 = vpop.f32.mrf.mxu1 }
  0xcc   :  { %v113_v20 = vadd.f32 %v3391_v19, %v112_v15 }
  0xcd   :  { %v3386_v16 = vpop.f32.mrf.mxu0  ;;  %v2836_v17 = vpop.f32.mrf.mxu1 }
  0xcf   :  { %v2878_v18 = vpop.f32.mrf.mxu0 }
  0xd4   :  { %v197_v41 = vpop.f32.mrf.mxu1 }
  0xd5   :  { %v794_v21 = vpop.f32.mrf.mxu0  ;;  %v198_v50 = vadd.f32 %v3391_v19, %v197_v41 }
  0xd6   :  { %v798_v22 = vadd.f32 %v794_v21, %v113_v20  ;;  %v2843_v42 = vpop.f32.mrf.mxu1 }
  0xd7   :  { %v2896_v23 = vpop.f32.mrf.mxu0 }
  0xd8   :  { %3097 = vtanh.f32 %v798_v22  ;;  %v2667_v25 = vmul.f32 -1.442695, %v798_v22 }
  0xda   :  { %3099 = vpow2.f32 %v2667_v25 }
  0xdb   :  { %v3445_v43 = vpop.f32.mrf.mxu1 }
  0xdd   :  { %v2857_v44 = vpop.f32.mrf.mxu1 }
  0xe0   :  { %v3447_v45 = vpop.f32.mrf.mxu1 }
  0xe2   :  { %v2871_v46 = vpop.f32.mrf.mxu1 }
  0xe4   :  { %v3449_v47 = vpop.f32.mrf.mxu1 }
  0xe5   :  { %v3098_v24 = vpop.eup %3097 }
  0xe6   :  { %808 = vrot.lane.b32.xlu0 %v3098_v24, %s3231_s29  ;;  %v2885_v48 = vpop.f32.mrf.mxu1 }
  0xe7   :  { %v3100_v26 = vpop.eup %3099 }
  0xe8   :  { %v802_v27 = vadd.f32 1.0, %v3100_v26 }
  0xea   :  { %3101 = vrcp.f32 %v802_v27 }
  0xf7   :  { %v3102_v28 = vpop.eup %3101 }
  0xf8   :  { %v806_v31 = vmul.f32 0.0, %v3102_v28 }
 0x158   :  { %v809_v29 = vpop.permute.xlu0 %808 }
 0x159   :  { %v811_v30 = vmul.f32 %v3102_v28, %v809_v29 }
 0x15b   :  { %813 = vrot.lane.b32.xlu0 %v811_v30, %s3231_s29  ;;  %v370_v30 = vadd.f32 %v3391_v19, %v3445_v43 }
 0x1cd   :  { %v814_v32 = vpop.permute.xlu0 %813 }
 0x1ce   :  { %v3396_v33 = vadd.f32 %v814_v32, %v806_v31 }
 0x1d0   :  { %3103 = vtanh.f32 %v3396_v33 }
 0x1dd   :  { %v3104_v37 = vpop.eup %3103 }
 0x1de   :  { %819 = vrot.lane.b32.xlu1 %v3104_v37, %s3231_s29 }
 0x250   :  { %v820_v39 = vpop.permute.xlu1 %819 }
 0x251   :  { %v822_v40 = vmul.f32 %v3102_v28, %v820_v39 }
 0x253   :  { %824 = vrot.lane.b32.xlu1 %v822_v40, %s3232_s0 }
 0x2c5   :  { %v825_v49 = vpop.permute.xlu1 %824 }
 0x2c6   :  { %827 = vst.msk [vmem:[#allocation3] sm:$0xff] %vm724_vm2, %v825_v49  ;;  %2906 = vmatmul.mubr.msk.f32.vlgmr.msra.gmra.mxu1 %vm724_vm2, %v825_v49 }
 0x2c7   :  { %2920 = vmatpush3.msra.mxu1 %v3333_v7  ;;  %2927 = vmatprep.mubr.msk.f32.mxu1 %vm3230_vm0, %v3229_v0 }
 0x2c8   :  { %2921 = vmatprep.subr.mxu1 %v3229_v0 }
 0x2c9   :  { %2922 = vmatpush3.msra.mxu1 %v3343_v8 }
 0x2ca   :  { %2923 = vmatprep.subr.mxu1 %v3229_v0 }
 0x2cb   :  { %2924 = vmatpush3.msra.mxu1 %v3352_v9 }
 0x2cc   :  { %2925 = vmatprep.subr.mxu1 %v3229_v0 }
 0x2cd   :  { %2926 = vmatpush3.msra.mxu1 %v3361_v10 }
 0x2ce   :  { %2941 = vmatprep.subr.mxu1 %v3229_v0 }
 0x386   :  { %v901_v51 = vpop.f32.mrf.mxu1 }
 0x387   :  { %v905_v52 = vadd.f32 %v901_v51, %v198_v50  ;;  %v456_v50 = vadd.f32 %v3391_v19, %v3384_v13 }
 0x388   :  { %v2907_v53 = vpop.f32.mrf.mxu1 }
 0x389   :  { %3105 = vtanh.f32 %v905_v52  ;;  %v2669_v55 = vmul.f32 -1.442695, %v905_v52 }
 0x38b   :  { %3107 = vpow2.f32 %v2669_v55 }
 0x396   :  { %v3106_v54 = vpop.eup %3105 }
 0x397   :  { %915 = vrot.lane.b32.xlu0 %v3106_v54, %s3231_s29 }
 0x398   :  { %v3108_v56 = vpop.eup %3107 }
 0x399   :  { %v909_v57 = vadd.f32 1.0, %v3108_v56 }
 0x39b   :  { %3109 = vrcp.f32 %v909_v57 }
 0x3a8   :  { %v3110_v58 = vpop.eup %3109 }
 0x3a9   :  { %v913_v61 = vmul.f32 %v3110_v58, %v3396_v33 }
 0x409   :  { %v916_v59 = vpop.permute.xlu0 %915 }
 0x40a   :  { %v918_v60 = vmul.f32 %v3110_v58, %v916_v59 }
 0x40c   :  { %920 = vrot.lane.b32.xlu1 %v918_v60, %s3231_s29 }
 0x47e   :  { %v921_v62 = vpop.permute.xlu1 %920 }
 0x47f   :  { %v923_v63 = vadd.f32 %v921_v62, %v913_v61 }
 0x481   :  { %3111 = vtanh.f32 %v923_v63 }
 0x48e   :  { %v3112_v1 = vpop.eup %3111 }
 0x48f   :  { %926 = vrot.lane.b32.xlu0 %v3112_v1, %s3231_s29 }
 0x501   :  { %v927_v2 = vpop.permute.xlu0 %926 }
 0x502   :  { %v929_v3 = vmul.f32 %v3110_v58, %v927_v2 }
 0x504   :  { %931 = vrot.lane.b32.xlu1 %v929_v3, %s3232_s0 }
 0x576   :  { %v932_v4 = vpop.permute.xlu1 %931 }
 0x577   :  { %935 = vst.msk [vmem:[#allocation3 + $0x8] sm:$0xff] %vm724_vm2, %v932_v4  ;;  %2917 = vmatmul.mubr.msk.f32.vlgmr.msra.gmra.mxu0 %vm724_vm2, %v932_v4 }
 0x578   :  { %2931 = vmatpush3.msra.mxu0 %v3333_v7  ;;  %2938 = vmatprep.mubr.msk.f32.mxu0 %vm3230_vm0, %v3229_v0 }
 0x579   :  { %2932 = vmatprep.subr.mxu0 %v3229_v0 }
 0x57a   :  { %2933 = vmatpush3.msra.mxu0 %v3343_v8 }
 0x57b   :  { %2934 = vmatprep.subr.mxu0 %v3229_v0 }
 0x57c   :  { %2935 = vmatpush3.msra.mxu0 %v3352_v9 }
 0x57d   :  { %2936 = vmatprep.subr.mxu0 %v3229_v0 }
 0x57e   :  { %2937 = vmatpush3.msra.mxu0 %v3361_v10 }
 0x57f   :  { %2952 = vmatprep.subr.mxu0 %v3229_v0 }
 0x637   :  { %v1009_v6 = vpop.f32.mrf.mxu0 }
 0x638   :  { %v1013_v12 = vadd.f32 %v1009_v6, %v284_v5 }
 0x639   :  { %v2918_v14 = vpop.f32.mrf.mxu0 }
 0x63a   :  { %3113 = vtanh.f32 %v1013_v12  ;;  %v2671_v17 = vmul.f32 -1.442695, %v1013_v12 }
 0x63c   :  { %3115 = vpow2.f32 %v2671_v17 }
 0x647   :  { %v3114_v15 = vpop.eup %3113 }
 0x648   :  { %1023 = vrot.lane.b32.xlu0 %v3114_v15, %s3231_s29 }
 0x649   :  { %v3116_v18 = vpop.eup %3115 }
 0x64a   :  { %v1017_v20 = vadd.f32 1.0, %v3116_v18 }
 0x64c   :  { %3117 = vrcp.f32 %v1017_v20 }
 0x659   :  { %v3118_v21 = vpop.eup %3117 }
 0x65a   :  { %v1021_v24 = vmul.f32 %v3118_v21, %v923_v63 }
 0x6ba   :  { %v1024_v22 = vpop.permute.xlu0 %1023 }
 0x6bb   :  { %v1026_v23 = vmul.f32 %v3118_v21, %v1024_v22 }
 0x6bd   :  { %1028 = vrot.lane.b32.xlu1 %v1026_v23, %s3231_s29 }
 0x72f   :  { %v1029_v25 = vpop.permute.xlu1 %1028 }
 0x730   :  { %v1031_v11 = vadd.f32 %v1029_v25, %v1021_v24 }
 0x732   :  { %3119 = vtanh.f32 %v1031_v11 }
 0x73f   :  { %v3120_v26 = vpop.eup %3119 }
 0x740   :  { %1034 = vrot.lane.b32.xlu0 %v3120_v26, %s3231_s29  ;;  %v1584_v26 = vld [vmem:[#allocation3] sm:$0xff] }
 0x7b2   :  { %v1035_v27 = vpop.permute.xlu0 %1034 }
 0x7b3   :  { %v1037_v28 = vmul.f32 %v3118_v21, %v1035_v27  ;;  %v1595_v21 = vld [vmem:[%s3777_s4 + $0x18] sm:$0xff]  ;;  %v1593_v27 = vld [vmem:[%s3777_s4 + $0x8] sm:$0xff] }
 0x7b5   :  { %1039 = vrot.lane.b32.xlu1 %v1037_v28, %s3232_s0  ;;  %v1592_v28 = vld [vmem:[%s3777_s4] sm:$0xff] }
 0x827   :  { %v1040_v29 = vpop.permute.xlu1 %1039 }
 0x828   :  { %1043 = vst.msk [vmem:[#allocation3 + $0x10] sm:$0xff] %vm724_vm2, %v1040_v29  ;;  %2928 = vmatmul.mubr.msk.f32.vlgmr.msra.gmra.mxu1 %vm724_vm2, %v1040_v29  ;;  %v1585_v29 = vld [vmem:[#allocation3 + $0x8] sm:$0xff] }
 0x829   :  { %2942 = vmatpush3.msra.mxu1 %v3333_v7  ;;  %2949 = vmatprep.mubr.msk.f32.mxu1 %vm3230_vm0, %v3229_v0 }
 0x82a   :  { %2943 = vmatprep.subr.mxu1 %v3229_v0 }
 0x82b   :  { %2944 = vmatpush3.msra.mxu1 %v3343_v8 }
 0x82c   :  { %2945 = vmatprep.subr.mxu1 %v3229_v0 }
 0x82d   :  { %2946 = vmatpush3.msra.mxu1 %v3352_v9 }
 0x82e   :  { %2947 = vmatprep.subr.mxu1 %v3229_v0 }
 0x82f   :  { %2948 = vmatpush3.msra.mxu1 %v3361_v10 }
 0x830   :  { %2963 = vmatprep.subr.mxu1 %v3229_v0 }
 0x8e8   :  { %v1117_v31 = vpop.f32.mrf.mxu1 }
 0x8e9   :  { %v1121_v32 = vadd.f32 %v1117_v31, %v370_v30  ;;  %v1586_v30 = vld [vmem:[#allocation3 + $0x10] sm:$0xff] }
 0x8ea   :  { %v2929_v33 = vpop.f32.mrf.mxu1 }
 0x8eb   :  { %3121 = vtanh.f32 %v1121_v32  ;;  %v2673_v35 = vmul.f32 -1.442695, %v1121_v32 }
 0x8ed   :  { %3123 = vpow2.f32 %v2673_v35 }
 0x8f8   :  { %v3122_v34 = vpop.eup %3121 }
 0x8f9   :  { %1131 = vrot.lane.b32.xlu0 %v3122_v34, %s3231_s29  ;;  %v628_v34 = vadd.f32 %v3391_v19, %v3386_v16 }
 0x8fa   :  { %v3124_v36 = vpop.eup %3123 }
 0x8fb   :  { %v1125_v37 = vadd.f32 1.0, %v3124_v36 }
 0x8fd   :  { %3125 = vrcp.f32 %v1125_v37 }
 0x90a   :  { %v3126_v38 = vpop.eup %3125 }
 0x90b   :  { %v1129_v41 = vmul.f32 %v3126_v38, %v1031_v11  ;;  %v1594_v11 = vld [vmem:[%s3777_s4 + $0x10] sm:$0xff] }
 0x96b   :  { %v1132_v39 = vpop.permute.xlu0 %1131 }
 0x96c   :  { %v1134_v40 = vmul.f32 %v3126_v38, %v1132_v39 }
 0x96e   :  { %1136 = vrot.lane.b32.xlu1 %v1134_v40, %s3231_s29 }
 0x9e0   :  { %v1137_v42 = vpop.permute.xlu1 %1136 }
 0x9e1   :  { %v1139_v43 = vadd.f32 %v1137_v42, %v1129_v41 }
 0x9e3   :  { %3127 = vtanh.f32 %v1139_v43 }
 0x9f0   :  { %v3128_v44 = vpop.eup %3127 }
 0x9f1   :  { %1142 = vrot.lane.b32.xlu0 %v3128_v44, %s3231_s29 }
 0xa63   :  { %v1143_v46 = vpop.permute.xlu0 %1142 }
 0xa64   :  { %v1145_v48 = vmul.f32 %v3126_v38, %v1143_v46 }
 0xa66   :  { %1147 = vrot.lane.b32.xlu1 %v1145_v48, %s3232_s0 }
 0xad8   :  { %v1148_v49 = vpop.permute.xlu1 %1147 }
 0xad9   :  { %1151 = vst.msk [vmem:[#allocation3 + $0x18] sm:$0xff] %vm724_vm2, %v1148_v49  ;;  %2939 = vmatmul.mubr.msk.f32.vlgmr.msra.gmra.mxu0 %vm724_vm2, %v1148_v49 }
 0xada   :  { %2953 = vmatpush3.msra.mxu0 %v3333_v7  ;;  %2960 = vmatprep.mubr.msk.f32.mxu0 %vm3230_vm0, %v3229_v0 }
 0xadb   :  { %2954 = vmatprep.subr.mxu0 %v3229_v0 }
 0xadc   :  { %2955 = vmatpush3.msra.mxu0 %v3343_v8 }
 0xadd   :  { %2956 = vmatprep.subr.mxu0 %v3229_v0 }
 0xade   :  { %2957 = vmatpush3.msra.mxu0 %v3352_v9 }
 0xadf   :  { %2958 = vmatprep.subr.mxu0 %v3229_v0 }
 0xae0   :  { %2959 = vmatpush3.msra.mxu0 %v3361_v10  ;;  %v1587_v31 = vld [vmem:[#allocation3 + $0x18] sm:$0xff] }
 0xae1   :  { %2974 = vmatprep.subr.mxu0 %v1595_v21 }
 0xb99   :  { %v1225_v51 = vpop.f32.mrf.mxu0 }
 0xb9a   :  { %v1229_v52 = vadd.f32 %v1225_v51, %v456_v50  ;;  %v3572_v50 = vld [vmem:[%s3778_s5 + $0x18] sm:$0xff]  ;;  %v3578_v51 = vld [vmem:[%s3778_s5 + $0x10] sm:$0xff] }
 0xb9b   :  { %v2940_v53 = vpop.f32.mrf.mxu0 }
 0xb9c   :  { %3129 = vtanh.f32 %v1229_v52  ;;  %v2675_v55 = vmul.f32 -1.442695, %v1229_v52  ;;  %v3585_v52 = vld [vmem:[%s3778_s5 + $0x8] sm:$0xff]  ;;  %v3592_v53 = vld [vmem:[%s3778_s5] sm:$0xff] }
 0xb9e   :  { %3131 = vpow2.f32 %v2675_v55 }
 0xba9   :  { %v3130_v54 = vpop.eup %3129 }
 0xbaa   :  { %1239 = vrot.lane.b32.xlu0 %v3130_v54, %s3231_s29 }
 0xbab   :  { %v3132_v56 = vpop.eup %3131 }
 0xbac   :  { %v1233_v57 = vadd.f32 1.0, %v3132_v56 }
 0xbae   :  { %3133 = vrcp.f32 %v1233_v57 }
 0xbbb   :  { %v3134_v58 = vpop.eup %3133 }
 0xbbc   :  { %v1237_v61 = vmul.f32 %v3134_v58, %v1139_v43 }
 0xc1c   :  { %v1240_v59 = vpop.permute.xlu0 %1239 }
 0xc1d   :  { %v1242_v60 = vmul.f32 %v3134_v58, %v1240_v59 }
 0xc1f   :  { %1244 = vrot.lane.b32.xlu1 %v1242_v60, %s3231_s29 }
 0xc91   :  { %v1245_v62 = vpop.permute.xlu1 %1244 }
 0xc92   :  { %v1247_v13 = vadd.f32 %v1245_v62, %v1237_v61 }
 0xc94   :  { %3135 = vtanh.f32 %v1247_v13 }
 0xca1   :  { %v3136_v63 = vpop.eup %3135 }
 0xca2   :  { %1250 = vrot.lane.b32.xlu0 %v3136_v63, %s3231_s29  ;;  %v3629_v63 = vld [vmem:[%s3779_s6] ss:$0 sm:$0xff] }
 0xd14   :  { %v1251_v1 = vpop.permute.xlu0 %1250 }
 0xd15   :  { %v1253_v2 = vmul.f32 %v3134_v58, %v1251_v1  ;;  %v714_v58 = vadd.f32 %v3391_v19, %v3449_v47 }
 0xd17   :  { %1255 = vrot.lane.b32.xlu1 %v1253_v2, %s3232_s0 }
 0xd89   :  { %v1256_v3 = vpop.permute.xlu1 %1255 }
 0xd8a   :  { %1259 = vst.msk [vmem:[#allocation3 + $0x20] sm:$0xff] %vm724_vm2, %v1256_v3  ;;  %2950 = vmatmul.mubr.msk.f32.vlgmr.msra.gmra.mxu1 %vm724_vm2, %v1256_v3 }
 0xd8b   :  { %2964 = vmatpush3.msra.mxu1 %v3333_v7  ;;  %2971 = vmatprep.mubr.msk.f32.mxu1 %vm3230_vm0, %v3229_v0  ;;  %v542_v7 = vadd.f32 %v3391_v19, %v3447_v45 }
 0xd8c   :  { %2965 = vmatprep.subr.mxu1 %v3229_v0 }
 0xd8d   :  { %2966 = vmatpush3.msra.mxu1 %v3343_v8 }
 0xd8e   :  { %2967 = vmatprep.subr.mxu1 %v3229_v0 }
 0xd8f   :  { %2968 = vmatpush3.msra.mxu1 %v3352_v9 }
 0xd90   :  { %2969 = vmatprep.subr.mxu1 %v3229_v0 }
 0xd91   :  { %2970 = vmatpush3.msra.mxu1 %v3361_v10  ;;  %v1588_v32 = vld [vmem:[#allocation3 + $0x20] sm:$0xff] }
 0xd92   :  { %2994 = vmatprep.subr.mxu1 %v3229_v0 }
 0xe4a   :  { %v1333_v4 = vpop.f32.mrf.mxu1 }
 0xe4b   :  { %v1337_v5 = vadd.f32 %v1333_v4, %v542_v7 }
 0xe4c   :  { %v2951_v6 = vpop.f32.mrf.mxu1 }
 0xe4d   :  { %3137 = vtanh.f32 %v1337_v5  ;;  %v2677_v8 = vmul.f32 -1.442695, %v1337_v5 }
 0xe4f   :  { %3139 = vpow2.f32 %v2677_v8 }
 0xe5a   :  { %v3138_v12 = vpop.eup %3137 }
 0xe5b   :  { %1347 = vrot.lane.b32.xlu0 %v3138_v12, %s3231_s29 }
 0xe5c   :  { %v3140_v14 = vpop.eup %3139 }
 0xe5d   :  { %v1341_v9 = vadd.f32 1.0, %v3140_v14 }
 0xe5f   :  { %3141 = vrcp.f32 %v1341_v9 }
 0xe6c   :  { %v3142_v15 = vpop.eup %3141 }
 0xe6d   :  { %v1345_v18 = vmul.f32 %v3142_v15, %v1247_v13 }
 0xecd   :  { %v1348_v17 = vpop.permute.xlu0 %1347 }
 0xece   :  { %v1350_v10 = vmul.f32 %v3142_v15, %v1348_v17 }
 0xed0   :  { %1352 = vrot.lane.b32.xlu1 %v1350_v10, %s3231_s29 }
 0xf42   :  { %v1353_v20 = vpop.permute.xlu1 %1352 }
 0xf43   :  { %v1355_v45 = vadd.f32 %v1353_v20, %v1345_v18 }
 0xf45   :  { %3143 = vtanh.f32 %v1355_v45 }
 0xf52   :  { %v3144_v22 = vpop.eup %3143 }
 0xf53   :  { %1358 = vrot.lane.b32.xlu0 %v3144_v22, %s3231_s29 }
 0xfc5   :  { %v1359_v23 = vpop.permute.xlu0 %1358 }
 0xfc6   :  { %v1361_v24 = vmul.f32 %v3142_v15, %v1359_v23 }
 0xfc8   :  { %1363 = vrot.lane.b32.xlu1 %v1361_v24, %s3232_s0 }
0x103a   :  { %v1364_v25 = vpop.permute.xlu1 %1363 }
0x103b   :  { %1367 = vst.msk [vmem:[#allocation3 + $0x28] sm:$0xff] %vm724_vm2, %v1364_v25  ;;  %2961 = vmatmul.mubr.msk.f32.vlgmr.msra.gmra.mxu0 %vm724_vm2, %v1364_v25 }
0x103c   :  { %2975 = vmatpush3.msra.mxu0 %v1595_v21  ;;  %2982 = vmatprep.mubr.msk.f32.mxu0 %vm724_vm2, %v1584_v26 }
0x103d   :  { %2976 = vmatprep.subr.mxu0 %v1594_v11 }
0x103e   :  { %2977 = vmatpush3.msra.mxu0 %v1594_v11 }
0x103f   :  { %2978 = vmatprep.subr.mxu0 %v1593_v27 }
0x1040   :  { %2979 = vmatpush3.msra.mxu0 %v1593_v27 }
0x1041   :  { %2980 = vmatprep.subr.mxu0 %v1592_v28 }
0x1042   :  { %2981 = vmatpush3.msra.mxu0 %v1592_v28  ;;  %v1589_v33 = vld [vmem:[#allocation3 + $0x28] sm:$0xff] }
0x1043   :  { %2983 = vmatmul.mubr.msk.f32.vlgmr.msra.gmra.mxu0 %vm724_vm2, %v1585_v29  ;;  %3016 = vmatprep.subr.mxu0 %v3229_v0 }
0x1044   :  { %2985 = vmatprep.mubr.msk.f32.mxu0 %vm724_vm2, %v1586_v30  ;;  %3017 = vmatpush3.msra.mxu0 %v3572_v50 }
0x1045   :  { %3018 = vmatprep.subr.mxu0 %v3229_v0 }
0x1046   :  { %3019 = vmatpush3.msra.mxu0 %v3578_v51 }
0x1047   :  { %2986 = vmatmul.mubr.msk.f32.gmra.mxu0 %vm724_vm2, %v1587_v31  ;;  %3020 = vmatprep.subr.mxu0 %v3229_v0 }
0x1048   :  { %2988 = vmatprep.mubr.msk.f32.mxu0 %vm724_vm2, %v1588_v32  ;;  %3021 = vmatpush3.msra.mxu0 %v3585_v52 }
0x1049   :  { %3022 = vmatprep.subr.mxu0 %v3229_v0 }
0x104a   :  { %3023 = vmatpush3.msra.mxu0 %v3592_v53 }
0x104b   :  { %2989 = vmatmul.mubr.msk.f32.gmra.mxu0 %vm724_vm2, %v1589_v33  ;;  %3038 = vmatprep.subr.mxu0 %v3229_v0 }
0x10fb   :  { %v1441_v35 = vpop.f32.mrf.mxu0 }
0x10fc   :  { %v1445_v36 = vadd.f32 %v1441_v35, %v628_v34 }
0x10fd   :  { %v2962_v37 = vpop.f32.mrf.mxu0 }
0x10fe   :  { %3145 = vtanh.f32 %v1445_v36  ;;  %v2679_v39 = vmul.f32 -1.442695, %v1445_v36 }
0x1100   :  { %3147 = vpow2.f32 %v2679_v39 }
0x1103   :  { %v3624_v59 = vpop.f32.mrf.mxu0 }
0x1104   :  { %v1699_v32 = vadd.f32 %v3624_v59, %v3629_v63 }
0x1105   :  { %v1693_v13 = vpop.f32.mrf.mxu0 }
0x1106   :  { %v1694_v1 = vadd.f32 %v3629_v63, %v1693_v13 }
0x110b   :  { %v3146_v38 = vpop.eup %3145 }
0x110c   :  { %1455 = vrot.lane.b32.xlu0 %v3146_v38, %s3231_s29 }
0x110d   :  { %v3148_v40 = vpop.eup %3147 }
0x110e   :  { %v1449_v41 = vadd.f32 1.0, %v3148_v40 }
0x1110   :  { %3149 = vrcp.f32 %v1449_v41 }
0x111d   :  { %v3150_v42 = vpop.eup %3149 }
0x111e   :  { %v1453_v46 = vmul.f32 %v3150_v42, %v1355_v45 }
0x117e   :  { %v1456_v43 = vpop.permute.xlu0 %1455 }
0x117f   :  { %v1458_v44 = vmul.f32 %v3150_v42, %v1456_v43 }
0x1181   :  { %1460 = vrot.lane.b32.xlu1 %v1458_v44, %s3231_s29 }
0x11f3   :  { %v1461_v48 = vpop.permute.xlu1 %1460 }
0x11f4   :  { %v3565_v16 = vadd.f32 %v1461_v48, %v1453_v46 }
0x11f6   :  { %3151 = vtanh.f32 %v3565_v16 }
0x1203   :  { %v3152_v49 = vpop.eup %3151 }
0x1204   :  { %1466 = vrot.lane.b32.xlu0 %v3152_v49, %s3231_s29 }
0x1276   :  { %v1467_v54 = vpop.permute.xlu0 %1466 }
0x1277   :  { %v1469_v55 = vmul.f32 %v3150_v42, %v1467_v54 }
0x1279   :  { %1471 = vrot.lane.b32.xlu1 %v1469_v55, %s3232_s0 }
0x12eb   :  { %v1472_v56 = vpop.permute.xlu1 %1471 }
0x12ec   :  { %1475 = vst.msk [vmem:[#allocation3 + $0x30] sm:$0xff] %vm724_vm2, %v1472_v56  ;;  %2972 = vmatmul.mubr.msk.f32.vlgmr.msra.gmra.mxu1 %vm724_vm2, %v1472_v56 }
0x12ed   :  { %2995 = vmatpush3.msra.mxu1 %v3572_v50  ;;  %3002 = vmatprep.mubr.msk.f32.mxu1 %vm3230_vm0, %v3229_v0 }
0x12ee   :  { %2996 = vmatprep.subr.mxu1 %v3229_v0 }
0x12ef   :  { %2997 = vmatpush3.msra.mxu1 %v3578_v51 }
0x12f0   :  { %2998 = vmatprep.subr.mxu1 %v3229_v0 }
0x12f1   :  { %2999 = vmatpush3.msra.mxu1 %v3585_v52 }
0x12f2   :  { %3000 = vmatprep.subr.mxu1 %v3229_v0 }
0x12f3   :  { %3001 = vmatpush3.msra.mxu1 %v3592_v53  ;;  %v1590_v57 = vld [vmem:[#allocation3 + $0x30] sm:$0xff] }
0x12f4   :  { %3003 = vmatmul.mubr.f32.vlgmr.msra.gmra.mxu1 %v3229_v0  ;;  %2991 = vmatprep.mubr.msk.f32.mxu0 %vm724_vm2, %v1590_v57  ;;  %v2987_v57 = vpop.f32.mrf.mxu0 }
0x12f5   :  { %3005 = vmatprep.subr.mxu1 %v3229_v0  ;;  %3013 = vmatprep.mubr.msk.f32.mxu1 %vm3230_vm0, %v3229_v0 }
0x12f6   :  { %3006 = vmatpush3.msra.mxu1 %v3572_v50 }
0x12f7   :  { %3007 = vmatprep.subr.mxu1 %v3229_v0 }
0x12f8   :  { %3008 = vmatpush3.msra.mxu1 %v3578_v51 }
0x12f9   :  { %3009 = vmatprep.subr.mxu1 %v3229_v0 }
0x12fa   :  { %3010 = vmatpush3.msra.mxu1 %v3585_v52 }
0x12fb   :  { %3011 = vmatprep.subr.mxu1 %v3229_v0 }
0x12fc   :  { %3012 = vmatpush3.msra.mxu1 %v3592_v53 }
0x12fd   :  { %3027 = vmatprep.subr.mxu1 %v3229_v0 }
0x13ac   :  { %v1549_v60 = vpop.f32.mrf.mxu1 }
0x13ad   :  { %v1553_v61 = vadd.f32 %v1549_v60, %v714_v58  ;;  %v1703_v58 = vpop.f32.mrf.mxu0 }
0x13ae   :  { %v2973_v62 = vpop.f32.mrf.mxu1  ;;  %v1704_v13 = vadd.f32 %v3629_v63, %v1703_v58 }
0x13af   :  { %v2681_v18 = vmul.f32 -1.442695, %v1553_v61  ;;  %v3673_v59 = vpop.f32.mrf.mxu0 }
0x13b1   :  { %v3675_v60 = vpop.f32.mrf.mxu0 }
0x13b4   :  { %v1811_v2 = vpop.f32.mrf.mxu1 }
0x13b5   :  { %v1815_v3 = vadd.f32 %v1811_v2, %v1694_v1 }
0x13b6   :  { %v3004_v7 = vpop.f32.mrf.mxu1 }
0x13b7   :  { %3153 = vtanh.f32 %v1815_v3  ;;  %v2691_v19 = vmul.f32 -1.442695, %v1815_v3 }
0x13b9   :  { %3155 = vpow2.f32 %v2691_v19 }
0x13c4   :  { %v3154_v4 = vpop.eup %3153 }
0x13c5   :  { %1825 = vrot.lane.b32.xlu0 %v3154_v4, %s3231_s29 }
0x13c6   :  { %v3156_v47 = vpop.eup %3155 }
0x13c7   :  { %v1819_v5 = vadd.f32 1.0, %v3156_v47 }
0x13c9   :  { %3157 = vrcp.f32 %v1819_v5 }
0x13d6   :  { %v3158_v6 = vpop.eup %3157 }
0x13d7   :  { %v1823_v14 = vmul.f32 0.0, %v3158_v6 }
0x1437   :  { %v1826_v12 = vpop.permute.xlu0 %1825 }
0x1438   :  { %v1828_v8 = vmul.f32 %v3158_v6, %v1826_v12 }
0x143a   :  { %1830 = vrot.lane.b32.xlu1 %v1828_v8, %s3231_s29 }
0x14ac   :  { %v1831_v9 = vpop.permute.xlu1 %1830 }
0x14ad   :  { %v1833_v15 = vadd.f32 %v1831_v9, %v1823_v14 }
0x14af   :  { %3159 = vtanh.f32 %v1833_v15 }
0x14b0   :  { %3161 = vtanh.f32 %v1553_v61 }
0x14b1   :  { %3163 = vpow2.f32 %v2681_v18 }
0x14bc   :  { %v3160_v17 = vpop.eup %3159 }
0x14bd   :  { %1836 = vrot.lane.b32.xlu0 %v3160_v17, %s3231_s29  ;;  %v3162_v10 = vpop.eup %3161 }
0x14be   :  { %v3164_v20 = vpop.eup %3163 }
0x14bf   :  { %v1557_v45 = vadd.f32 1.0, %v3164_v20  ;;  %v1709_v20 = vadd.f32 %v2987_v57, %v3629_v63 }
0x14c1   :  { %1563 = vrot.lane.b32.xlu0 %v3162_v10, %s3231_s29  ;;  %3165 = vrcp.f32 %v1557_v45 }
0x14ce   :  { %v3166_v23 = vpop.eup %3165 }
0x14cf   :  { %v1561_v26 = vmul.f32 %v3166_v23, %v3565_v16 }
0x152f   :  { %v1837_v21 = vpop.permute.xlu0 %1836 }
0x1530   :  { %v1839_v22 = vmul.f32 %v3158_v6, %v1837_v21 }
0x1532   :  { %1842 = vrot.lane.b32.xlu1 %v1839_v22, %s3232_s0 }
0x1533   :  { %v1564_v24 = vpop.permute.xlu0 %1563 }
0x1534   :  { %v1566_v25 = vmul.f32 %v3166_v23, %v1564_v24 }
0x1536   :  { %1568 = vrot.lane.b32.xlu0 %v1566_v25, %s3231_s29 }
0x15a4   :  { %v1843_v11 = vpop.permute.xlu1 %1842 }
0x15a5   :  { %3014 = vmatmul.mubr.msk.f32.vlgmr.msra.gmra.mxu1 %vm724_vm2, %v1843_v11 }
0x15a6   :  { %3028 = vmatpush3.msra.mxu1 %v3572_v50  ;;  %3035 = vmatprep.mubr.msk.f32.mxu1 %vm3230_vm0, %v3229_v0 }
0x15a7   :  { %3029 = vmatprep.subr.mxu1 %v3229_v0 }
0x15a8   :  { %v1569_v27 = vpop.permute.xlu0 %1568  ;;  %3030 = vmatpush3.msra.mxu1 %v3578_v51 }
0x15a9   :  { %v1571_v28 = vadd.f32 %v1569_v27, %v1561_v26  ;;  %3031 = vmatprep.subr.mxu1 %v3229_v0 }
0x15aa   :  { %3032 = vmatpush3.msra.mxu1 %v3585_v52 }
0x15ab   :  { %3167 = vtanh.f32 %v1571_v28  ;;  %3033 = vmatprep.subr.mxu1 %v3229_v0 }
0x15ac   :  { %3034 = vmatpush3.msra.mxu1 %v3592_v53 }
0x15ad   :  { %3049 = vmatprep.subr.mxu1 %v3229_v0 }
0x15b8   :  { %v3168_v29 = vpop.eup %3167 }
0x15b9   :  { %1574 = vrot.lane.b32.xlu0 %v3168_v29, %s3231_s29 }
0x162b   :  { %v1575_v30 = vpop.permute.xlu0 %1574 }
0x162c   :  { %v1577_v31 = vmul.f32 %v3166_v23, %v1575_v30 }
0x162e   :  { %1579 = vrot.lane.b32.xlu0 %v1577_v31, %s3232_s0 }
0x1665   :  { %v1912_v33 = vpop.f32.mrf.mxu1 }
0x1666   :  { %v1916_v34 = vadd.f32 %v1912_v33, %v1699_v32 }
0x1667   :  { %v3015_v35 = vpop.f32.mrf.mxu1 }
0x1668   :  { %3169 = vtanh.f32 %v1916_v34  ;;  %v2693_v39 = vmul.f32 -1.442695, %v1916_v34 }
0x166a   :  { %3171 = vpow2.f32 %v2693_v39 }
0x1675   :  { %v3170_v36 = vpop.eup %3169 }
0x1676   :  { %1926 = vrot.lane.b32.xlu1 %v3170_v36, %s3231_s29  ;;  %v1714_v36 = vadd.f32 %v3629_v63, %v3675_v60  ;;  %v1719_v60 = vadd.f32 %v3673_v59, %v3629_v63 }
0x1677   :  { %v3172_v40 = vpop.eup %3171 }
0x1678   :  { %v1920_v41 = vadd.f32 1.0, %v3172_v40 }
0x167a   :  { %3173 = vrcp.f32 %v1920_v41 }
0x1687   :  { %v3174_v42 = vpop.eup %3173 }
0x1688   :  { %v1924_v46 = vmul.f32 %v3174_v42, %v1833_v15 }
0x16a0   :  { %v1580_v37 = vpop.permute.xlu0 %1579 }
0x16a1   :  { %1583 = vst.msk [vmem:[#allocation3 + $0x38] sm:$0xff] %vm724_vm2, %v1580_v37 }
0x16a8   :  { %v1591_v38 = vld [vmem:[#allocation3 + $0x38] sm:$0xff] }
0x16a9   :  { %2992 = vmatmul.mubr.msk.f32.gmra.mxu0 %vm724_vm2, %v1591_v38 }
0x16aa   :  { %3024 = vmatprep.mubr.msk.f32.mxu0 %vm3230_vm0, %v3229_v0 }
0x16e8   :  { %v1927_v43 = vpop.permute.xlu1 %1926 }
0x16e9   :  { %v1929_v44 = vmul.f32 %v3174_v42, %v1927_v43 }
0x16eb   :  { %1931 = vrot.lane.b32.xlu1 %v1929_v44, %s3231_s29 }
0x175d   :  { %v1932_v48 = vpop.permute.xlu1 %1931 }
0x175e   :  { %v1934_v16 = vadd.f32 %v1932_v48, %v1924_v46 }
0x1760   :  { %3175 = vtanh.f32 %v1934_v16 }
0x1769   :  { %v3677_v61 = vpop.f32.mrf.mxu0 }
0x176b   :  { %v3679_v62 = vpop.f32.mrf.mxu0 }
0x176d   :  { %v3176_v49 = vpop.eup %3175 }
0x176e   :  { %1937 = vrot.lane.b32.xlu1 %v3176_v49, %s3231_s29 }
0x17e0   :  { %v1938_v54 = vpop.permute.xlu1 %1937 }
0x17e1   :  { %v1940_v55 = vmul.f32 %v3174_v42, %v1938_v54 }
0x17e3   :  { %1943 = vrot.lane.b32.xlu1 %v1940_v55, %s3232_s0 }
0x1855   :  { %v1944_v56 = vpop.permute.xlu1 %1943 }
0x1856   :  { %3025 = vmatmul.mubr.msk.f32.vlgmr.msra.gmra.mxu0 %vm724_vm2, %v1944_v56 }
0x1857   :  { %3039 = vmatpush3.msra.mxu0 %v3572_v50  ;;  %3046 = vmatprep.mubr.msk.f32.mxu0 %vm3230_vm0, %v3229_v0 }
0x1858   :  { %3040 = vmatprep.subr.mxu0 %v3229_v0 }
0x1859   :  { %3041 = vmatpush3.msra.mxu0 %v3578_v51 }
0x185a   :  { %3042 = vmatprep.subr.mxu0 %v3229_v0 }
0x185b   :  { %3043 = vmatpush3.msra.mxu0 %v3585_v52 }
0x185c   :  { %3044 = vmatprep.subr.mxu0 %v3229_v0 }
0x185d   :  { %3045 = vmatpush3.msra.mxu0 %v3592_v53 }
0x185e   :  { %3060 = vmatprep.subr.mxu0 %v3229_v0 }
0x1916   :  { %v2013_v1 = vpop.f32.mrf.mxu0 }
0x1917   :  { %v2017_v2 = vadd.f32 %v2013_v1, %v1704_v13 }
0x1918   :  { %v3026_v3 = vpop.f32.mrf.mxu0 }
0x1919   :  { %3177 = vtanh.f32 %v2017_v2  ;;  %v2695_v4 = vmul.f32 -1.442695, %v2017_v2 }
0x191b   :  { %3179 = vpow2.f32 %v2695_v4 }
0x1926   :  { %v3178_v7 = vpop.eup %3177 }
0x1927   :  { %2027 = vrot.lane.b32.xlu0 %v3178_v7, %s3231_s29 }
0x1928   :  { %v3180_v19 = vpop.eup %3179 }
0x1929   :  { %v2021_v47 = vadd.f32 1.0, %v3180_v19 }
0x192b   :  { %3181 = vrcp.f32 %v2021_v47 }
0x1938   :  { %v3182_v5 = vpop.eup %3181 }
0x1939   :  { %v2025_v8 = vmul.f32 %v3182_v5, %v1934_v16 }
0x1999   :  { %v2028_v6 = vpop.permute.xlu0 %2027 }
0x199a   :  { %v2030_v12 = vmul.f32 %v3182_v5, %v2028_v6 }
0x199c   :  { %2032 = vrot.lane.b32.xlu1 %v2030_v12, %s3231_s29 }
0x1a0e   :  { %v2033_v14 = vpop.permute.xlu1 %2032 }
0x1a0f   :  { %v2035_v9 = vadd.f32 %v2033_v14, %v2025_v8  ;;  %v1724_v14 = vadd.f32 %v3629_v63, %v3679_v62 }
0x1a11   :  { %3183 = vtanh.f32 %v2035_v9 }
0x1a1e   :  { %v3184_v15 = vpop.eup %3183 }
0x1a1f   :  { %2038 = vrot.lane.b32.xlu0 %v3184_v15, %s3231_s29 }
0x1a91   :  { %v2039_v17 = vpop.permute.xlu0 %2038 }
0x1a92   :  { %v2041_v10 = vmul.f32 %v3182_v5, %v2039_v17 }
0x1a94   :  { %2044 = vrot.lane.b32.xlu1 %v2041_v10, %s3232_s0 }
0x1b06   :  { %v2045_v18 = vpop.permute.xlu1 %2044 }
0x1b07   :  { %3036 = vmatmul.mubr.msk.f32.vlgmr.msra.gmra.mxu1 %vm724_vm2, %v2045_v18 }
0x1b08   :  { %3050 = vmatpush3.msra.mxu1 %v3572_v50  ;;  %3057 = vmatprep.mubr.msk.f32.mxu1 %vm3230_vm0, %v3229_v0 }
0x1b09   :  { %3051 = vmatprep.subr.mxu1 %v3229_v0 }
0x1b0a   :  { %3052 = vmatpush3.msra.mxu1 %v3578_v51 }
0x1b0b   :  { %3053 = vmatprep.subr.mxu1 %v3229_v0 }
0x1b0c   :  { %3054 = vmatpush3.msra.mxu1 %v3585_v52 }
0x1b0d   :  { %3055 = vmatprep.subr.mxu1 %v3229_v0 }
0x1b0e   :  { %3056 = vmatpush3.msra.mxu1 %v3592_v53 }
0x1b0f   :  { %3071 = vmatprep.subr.mxu1 %v3229_v0 }
0x1bc7   :  { %v2114_v45 = vpop.f32.mrf.mxu1 }
0x1bc8   :  { %v2118_v21 = vadd.f32 %v2114_v45, %v1709_v20 }
0x1bc9   :  { %v3037_v22 = vpop.f32.mrf.mxu1 }
0x1bca   :  { %3185 = vtanh.f32 %v2118_v21  ;;  %v2697_v24 = vmul.f32 -1.442695, %v2118_v21 }
0x1bcc   :  { %3187 = vpow2.f32 %v2697_v24 }
0x1bd7   :  { %v3186_v23 = vpop.eup %3185 }
0x1bd8   :  { %2128 = vrot.lane.b32.xlu0 %v3186_v23, %s3231_s29 }
0x1bd9   :  { %v3188_v25 = vpop.eup %3187 }
0x1bda   :  { %v2122_v11 = vadd.f32 1.0, %v3188_v25 }
0x1bdc   :  { %3189 = vrcp.f32 %v2122_v11 }
0x1be9   :  { %v3190_v26 = vpop.eup %3189 }
0x1bea   :  { %v2126_v29 = vmul.f32 %v3190_v26, %v2035_v9 }
0x1c4a   :  { %v2129_v27 = vpop.permute.xlu0 %2128 }
0x1c4b   :  { %v2131_v28 = vmul.f32 %v3190_v26, %v2129_v27 }
0x1c4d   :  { %2133 = vrot.lane.b32.xlu1 %v2131_v28, %s3231_s29 }
0x1cbf   :  { %v2134_v30 = vpop.permute.xlu1 %2133 }
0x1cc0   :  { %v2136_v31 = vadd.f32 %v2134_v30, %v2126_v29  ;;  %v1729_v29 = vadd.f32 %v3677_v61, %v3629_v63  ;;  %v2550_v61 = vld [vmem:[%s3780_s7 + $0x18] sm:$0xff] }
0x1cc2   :  { %3191 = vtanh.f32 %v2136_v31 }
0x1ccf   :  { %v3192_v32 = vpop.eup %3191 }
0x1cd0   :  { %2139 = vrot.lane.b32.xlu0 %v3192_v32, %s3231_s29 }
0x1d42   :  { %v2140_v33 = vpop.permute.xlu0 %2139 }
0x1d43   :  { %v2142_v34 = vmul.f32 %v3190_v26, %v2140_v33 }
0x1d45   :  { %2145 = vrot.lane.b32.xlu1 %v2142_v34, %s3232_s0 }
0x1db7   :  { %v2146_v35 = vpop.permute.xlu1 %2145 }
0x1db8   :  { %3047 = vmatmul.mubr.msk.f32.vlgmr.msra.gmra.mxu0 %vm724_vm2, %v2146_v35 }
0x1db9   :  { %3061 = vmatpush3.msra.mxu0 %v3572_v50  ;;  %3068 = vmatprep.mubr.msk.f32.mxu0 %vm3230_vm0, %v3229_v0 }
0x1dba   :  { %3062 = vmatprep.subr.mxu0 %v3229_v0 }
0x1dbb   :  { %3063 = vmatpush3.msra.mxu0 %v3578_v51 }
0x1dbc   :  { %3064 = vmatprep.subr.mxu0 %v3229_v0 }
0x1dbd   :  { %3065 = vmatpush3.msra.mxu0 %v3585_v52 }
0x1dbe   :  { %3066 = vmatprep.subr.mxu0 %v3229_v0 }
0x1dbf   :  { %3067 = vmatpush3.msra.mxu0 %v3592_v53 }
0x1dc0   :  { %3082 = vmatprep.subr.mxu0 %v3229_v0 }
0x1e78   :  { %v2215_v37 = vpop.f32.mrf.mxu0 }
0x1e79   :  { %v2219_v38 = vadd.f32 %v2215_v37, %v1714_v36 }
0x1e7a   :  { %v3048_v39 = vpop.f32.mrf.mxu0 }
0x1e7b   :  { %3193 = vtanh.f32 %v2219_v38  ;;  %v2699_v41 = vmul.f32 -1.442695, %v2219_v38 }
0x1e7d   :  { %3195 = vpow2.f32 %v2699_v41 }
0x1e88   :  { %v3194_v40 = vpop.eup %3193 }
0x1e89   :  { %2229 = vrot.lane.b32.xlu0 %v3194_v40, %s3231_s29 }
0x1e8a   :  { %v3196_v42 = vpop.eup %3195 }
0x1e8b   :  { %v2223_v43 = vadd.f32 1.0, %v3196_v42  ;;  %v2549_v42 = vld [vmem:[%s3780_s7 + $0x10] sm:$0xff] }
0x1e8d   :  { %3197 = vrcp.f32 %v2223_v43  ;;  %v2548_v43 = vld [vmem:[%s3780_s7 + $0x8] sm:$0xff] }
0x1e9a   :  { %v3198_v44 = vpop.eup %3197 }
0x1e9b   :  { %v2227_v16 = vmul.f32 %v3198_v44, %v2136_v31 }
0x1efb   :  { %v2230_v46 = vpop.permute.xlu0 %2229 }
0x1efc   :  { %v2232_v48 = vmul.f32 %v3198_v44, %v2230_v46 }
0x1efe   :  { %2234 = vrot.lane.b32.xlu1 %v2232_v48, %s3231_s29 }
0x1f70   :  { %v2235_v49 = vpop.permute.xlu1 %2234 }
0x1f71   :  { %v2237_v54 = vadd.f32 %v2235_v49, %v2227_v16 }
0x1f73   :  { %3199 = vtanh.f32 %v2237_v54 }
0x1f80   :  { %v3200_v55 = vpop.eup %3199 }
0x1f81   :  { %2240 = vrot.lane.b32.xlu0 %v3200_v55, %s3231_s29 }
0x1ff3   :  { %v2241_v56 = vpop.permute.xlu0 %2240 }
0x1ff4   :  { %v2243_v57 = vmul.f32 %v3198_v44, %v2241_v56  ;;  %v2547_v44 = vld [vmem:[%s3780_s7] sm:$0xff] }
0x1ff6   :  { %2246 = vrot.lane.b32.xlu1 %v2243_v57, %s3232_s0 }
0x2068   :  { %v2247_v58 = vpop.permute.xlu1 %2246 }
0x2069   :  { %3058 = vmatmul.mubr.msk.f32.vlgmr.msra.gmra.mxu1 %vm724_vm2, %v2247_v58 }
0x206a   :  { %3072 = vmatpush3.msra.mxu1 %v3572_v50  ;;  %3079 = vmatprep.mubr.msk.f32.mxu1 %vm3230_vm0, %v3229_v0 }
0x206b   :  { %3073 = vmatprep.subr.mxu1 %v3229_v0 }
0x206c   :  { %3074 = vmatpush3.msra.mxu1 %v3578_v51 }
0x206d   :  { %3075 = vmatprep.subr.mxu1 %v3229_v0 }
0x206e   :  { %3076 = vmatpush3.msra.mxu1 %v3585_v52 }
0x206f   :  { %3077 = vmatprep.subr.mxu1 %v3229_v0 }
0x2070   :  { %3078 = vmatpush3.msra.mxu1 %v3592_v53 }
0x2129   :  { %v2316_v13 = vpop.f32.mrf.mxu1 }
0x212a   :  { %v2320_v50 = vadd.f32 %v2316_v13, %v1719_v60 }
0x212b   :  { %v3059_v1 = vpop.f32.mrf.mxu1 }
0x212c   :  { %3201 = vtanh.f32 %v2320_v50  ;;  %v2701_v3 = vmul.f32 -1.442695, %v2320_v50 }
0x212e   :  { %3203 = vpow2.f32 %v2701_v3 }
0x2139   :  { %v3202_v2 = vpop.eup %3201 }
0x213a   :  { %2330 = vrot.lane.b32.xlu0 %v3202_v2, %s3231_s29 }
0x213b   :  { %v3204_v51 = vpop.eup %3203 }
0x213c   :  { %v2324_v7 = vadd.f32 1.0, %v3204_v51 }
0x213e   :  { %3205 = vrcp.f32 %v2324_v7 }
0x214b   :  { %v3206_v52 = vpop.eup %3205 }
0x214c   :  { %v2328_v53 = vmul.f32 %v3206_v52, %v2237_v54  ;;  %v2706_v54 = vld [vmem:[%s3781_s8] ss:$0 sm:$0xff] }
0x21ac   :  { %v2331_v4 = vpop.permute.xlu0 %2330 }
0x21ad   :  { %v2333_v19 = vmul.f32 %v3206_v52, %v2331_v4 }
0x21af   :  { %2335 = vrot.lane.b32.xlu1 %v2333_v19, %s3231_s29 }
0x2221   :  { %v2336_v47 = vpop.permute.xlu1 %2335 }
0x2222   :  { %v2338_v59 = vadd.f32 %v2336_v47, %v2328_v53 }
0x2224   :  { %3207 = vtanh.f32 %v2338_v59 }
0x2231   :  { %v3208_v5 = vpop.eup %3207 }
0x2232   :  { %2341 = vrot.lane.b32.xlu0 %v3208_v5, %s3231_s29 }
0x22a4   :  { %v2342_v6 = vpop.permute.xlu0 %2341 }
0x22a5   :  { %v2344_v12 = vmul.f32 %v3206_v52, %v2342_v6 }
0x22a7   :  { %2347 = vrot.lane.b32.xlu1 %v2344_v12, %s3232_s0 }
0x2319   :  { %v2348_v8 = vpop.permute.xlu1 %2347 }
0x231a   :  { %3069 = vmatmul.mubr.msk.f32.vlgmr.msra.gmra.mxu0 %vm724_vm2, %v2348_v8 }
0x231b   :  { %3090 = vmatprep.mubr.msk.f32.mxu0 %vm3230_vm0, %v3229_v0  ;;  %3083 = vmatpush3.msra.mxu0 %v2550_v61 }
0x231c   :  { %3084 = vmatprep.subr.mxu0 %v3229_v0 }
0x231d   :  { %3085 = vmatpush3.msra.mxu0 %v2549_v42 }
0x231e   :  { %3086 = vmatprep.subr.mxu0 %v3229_v0 }
0x231f   :  { %3087 = vmatpush3.msra.mxu0 %v2548_v43 }
0x2320   :  { %3088 = vmatprep.subr.mxu0 %v3229_v0 }
0x2321   :  { %3089 = vmatpush3.msra.mxu0 %v2547_v44 }
0x23da   :  { %v2417_v9 = vpop.f32.mrf.mxu0 }
0x23db   :  { %v2421_v15 = vadd.f32 %v2417_v9, %v1724_v14 }
0x23dc   :  { %v3070_v17 = vpop.f32.mrf.mxu0 }
0x23dd   :  { %3209 = vtanh.f32 %v2421_v15  ;;  %v2703_v18 = vmul.f32 -1.442695, %v2421_v15 }
0x23df   :  { %3211 = vpow2.f32 %v2703_v18 }
0x23ea   :  { %v3210_v10 = vpop.eup %3209 }
0x23eb   :  { %2431 = vrot.lane.b32.xlu0 %v3210_v10, %s3231_s29 }
0x23ec   :  { %v3212_v20 = vpop.eup %3211 }
0x23ed   :  { %v2425_v45 = vadd.f32 1.0, %v3212_v20 }
0x23ef   :  { %3213 = vrcp.f32 %v2425_v45 }
0x23fc   :  { %v3214_v21 = vpop.eup %3213 }
0x23fd   :  { %v2429_v24 = vmul.f32 %v3214_v21, %v2338_v59 }
0x245d   :  { %v2432_v22 = vpop.permute.xlu0 %2431 }
0x245e   :  { %v2434_v23 = vmul.f32 %v3214_v21, %v2432_v22 }
0x2460   :  { %2436 = vrot.lane.b32.xlu1 %v2434_v23, %s3231_s29 }
0x24d2   :  { %v2437_v25 = vpop.permute.xlu1 %2436 }
0x24d3   :  { %v2439_v62 = vadd.f32 %v2437_v25, %v2429_v24 }
0x24d5   :  { %3215 = vtanh.f32 %v2439_v62 }
0x24e2   :  { %v3216_v11 = vpop.eup %3215 }
0x24e3   :  { %2442 = vrot.lane.b32.xlu0 %v3216_v11, %s3231_s29 }
0x2555   :  { %v2443_v26 = vpop.permute.xlu0 %2442 }
0x2556   :  { %v2445_v27 = vmul.f32 %v3214_v21, %v2443_v26 }
0x2558   :  { %2448 = vrot.lane.b32.xlu1 %v2445_v27, %s3232_s0 }
0x25ca   :  { %v2449_v28 = vpop.permute.xlu1 %2448 }
0x25cb   :  { %3080 = vmatmul.mubr.msk.f32.vlgmr.msra.gmra.mxu1 %vm724_vm2, %v2449_v28 }
0x268b   :  { %v2518_v30 = vpop.f32.mrf.mxu1 }
0x268c   :  { %v2522_v31 = vadd.f32 %v2518_v30, %v1729_v29 }
0x268d   :  { %v3081_v32 = vpop.f32.mrf.mxu1 }
0x268e   :  { %3217 = vtanh.f32 %v2522_v31  ;;  %v2705_v34 = vmul.f32 -1.442695, %v2522_v31 }
0x2690   :  { %3219 = vpow2.f32 %v2705_v34 }
0x269b   :  { %v3218_v33 = vpop.eup %3217 }
0x269c   :  { %2532 = vrot.lane.b32.xlu0 %v3218_v33, %s3231_s29 }
0x269d   :  { %v3220_v35 = vpop.eup %3219 }
0x269e   :  { %v2526_v36 = vadd.f32 1.0, %v3220_v35 }
0x26a0   :  { %3221 = vrcp.f32 %v2526_v36 }
0x26ad   :  { %v3222_v37 = vpop.eup %3221 }
0x26ae   :  { %v2530_v40 = vmul.f32 %v3222_v37, %v2439_v62 }
0x270e   :  { %v2533_v38 = vpop.permute.xlu0 %2532 }
0x270f   :  { %v2535_v39 = vmul.f32 %v3222_v37, %v2533_v38 }
0x2711   :  { %2537 = vrot.lane.b32.xlu1 %v2535_v39, %s3231_s29 }
0x2783   :  { %v2538_v41 = vpop.permute.xlu1 %2537 }
0x2784   :  { %v2540_v63 = vadd.f32 %v2538_v41, %v2530_v40 }
0x2786   :  { %3223 = vtanh.f32 %v2540_v63 }
0x2793   :  { %v3224_v46 = vpop.eup %3223 }
0x2794   :  { %2543 = vrot.lane.b32.xlu0 %v3224_v46, %s3231_s29 }
0x2806   :  { %v2544_v48 = vpop.permute.xlu0 %2543 }
0x2807   :  { %v2546_v16 = vmul.f32 %v3222_v37, %v2544_v48 }
0x2809   :  { %2559 = vrot.lane.b32.xlu1 %v2546_v16, %s3232_s0 }
0x287b   :  { %v2560_v49 = vpop.permute.xlu1 %2559 }
0x287c   :  { %3091 = vmatmul.mubr.msk.f32.vlgmr.msra.gmra.mxu0 %vm724_vm2, %v2560_v49 }
0x293c   :  { %v2629_v55 = vpop.f32.mrf.mxu0 }
0x293d   :  { %v2630_v56 = vadd.f32 %v2706_v54, %v2629_v55 }
0x293e   :  { %v3092_v57 = vpop.f32.mrf.mxu0 }
0x293f   :  { %v2708_v58 = vmul.f32 -1.442695, %v2630_v56 }
0x2941   :  { %3225 = vpow2.f32 %v2708_v58 }
0x294e   :  { %v3226_v0 = vpop.eup %3225 }
0x294f   :  { %v2636_v60 = vadd.f32 1.0, %v3226_v0 }
0x2951   :  { %3227 = vrcp.f32 %v2636_v60 }
0x295e   :  { %v3228_v13 = vpop.eup %3227 }
0x295f   :  { %2639 = vst [vmem:[%s3782_s9] sm:$0xff] %v3228_v13 }

</bundles_post_ra>
